<compile_context>
chip_gen: v7x
topology: tpu7x:2x2x1
jax: 0.10.0
libtpu: 0.0.40
codegen_flags: <defaults>
</compile_context>

<pallas_src>
import functools

import jax
import jax.numpy as jnp
from jax.experimental import pallas as pl
from jax.experimental.pallas import tpu as pltpu

LANE = 128       # vreg lane width: output minor dims padded to this
KPAD = 256       # MXU tile for bf16 on v6e/v7x: contraction dims padded to this


def _round_up(v, m):
    return (v + m - 1) // m * m


def _fused_gcn_kernel(a_ref, x_ref, w1_ref, b1_ref, w2_ref, b2_ref,
                      o_ref, a_vmem, xw1_vmem, hw2_vmem):
    """Three-phase fused GCN forward.

    phase 0: stash streamed A row tile, compute XW1[rows] = X[rows] @ W1
    phase 1: HW2[rows] = relu(A[rows,:] @ XW1 + b1) @ W2
    phase 2: out[rows] = log_softmax(A[rows,:] @ HW2 + b2)
    """
    phase = pl.program_id(0)
    r = pl.program_id(1)
    row_tile = a_ref.shape[0]
    start = pl.multiple_of(r * row_tile, row_tile)
    rows = pl.ds(start, row_tile)

    @pl.when(phase == 0)
    def _():
        # A is streamed from HBM exactly once; keep it resident for both layers.
        a_vmem[rows, :] = a_ref[...]
        # Layer-1 feature transform for the same rows (f32 accumulate -> bf16).
        xw1_vmem[rows, :] = jnp.dot(
            x_ref[...], w1_ref[...],
            preferred_element_type=jnp.float32).astype(xw1_vmem.dtype)

    @pl.when(phase == 1)
    def _():
        # H[rows] = relu(A[rows,:] @ XW1 + b1); eval-mode dropout is identity.
        h = jnp.dot(a_vmem[rows, :], xw1_vmem[...],
                    preferred_element_type=jnp.float32)
        h = jnp.maximum(h + b1_ref[...], 0.0)
        # Fuse the (tiny) layer-2 feature transform so H never leaves VMEM.
        hw2_vmem[rows, :] = jnp.dot(
            h.astype(w2_ref.dtype), w2_ref[...],
            preferred_element_type=jnp.float32).astype(hw2_vmem.dtype)

    @pl.when(phase == 2)
    def _():
        # Z[rows] = A[rows,:] @ HW2 + b2.  Dead class lanes carry a finite -1e30
        # bias, so exp() underflows to 0 and no iota/mask epilogue is needed.
        z = jnp.dot(a_vmem[rows, :], hw2_vmem[...],
                    preferred_element_type=jnp.float32) + b2_ref[...]
        m = jnp.max(z, axis=1, keepdims=True)
        e = jnp.exp(z - m)
        logsum = jnp.log(jnp.sum(e, axis=1, keepdims=True))
        o_ref[...] = (z - m - logsum).astype(o_ref.dtype)


def gcn_forward(a_p, x_p, w1_p, b1_p, w2_p, b2_p, *,
                num_nodes, num_classes, row_tile=256):
    """Full Net.forward on pre-padded operands: conv1 -> relu -> conv2 -> log_softmax."""
    n_pad = a_p.shape[0]
    f_pad = x_p.shape[1]
    h_pad = w1_p.shape[1]
    c_pad = w2_p.shape[1]
    if n_pad % row_tile != 0:
        raise ValueError("row_tile must divide the padded node count")
    num_tiles = n_pad // row_tile
    last = num_tiles - 1

    # Streamed inputs iterate over row tiles in phase 0 only; afterwards they are
    # pinned to their last block index so Pallas issues no further HBM fetches.
    def a_map(p, r):
        return (jnp.where(p == 0, r, last), 0)

    def x_map(p, r):
        return (jnp.where(p == 0, r, last), 0)

    def const_map(p, r):
        return (0, 0)

    # Output only materializes in phase 2; keep the block index constant before
    # that so no garbage write-backs happen.
    def out_map(p, r):
        return (jnp.where(p == 2, r, 0), 0)

    # VMEM budget computed from actual buffer sizes (+ headroom for f32
    # temporaries / compiler scratch), capped below v7x's 64 MiB physical VMEM.
    bf16 = 2
    scratch_bytes = (n_pad * n_pad + n_pad * h_pad + n_pad * c_pad) * bf16
    stream_bytes = 2 * (row_tile * n_pad + row_tile * f_pad) * bf16   # 2x-buffered tiles
    resident_bytes = 2 * (f_pad * h_pad + h_pad * c_pad) * bf16 + 2 * (h_pad + c_pad) * 4
    out_bytes = 2 * row_tile * c_pad * 4
    est = scratch_bytes + stream_bytes + resident_bytes + out_bytes
    vmem_limit = min(max(est + (8 << 20), 16 << 20), 56 << 20)

    out_pad = pl.pallas_call(
        _fused_gcn_kernel,
        out_shape=jax.ShapeDtypeStruct((n_pad, c_pad), jnp.float32),
        grid=(3, num_tiles),
        in_specs=[
            pl.BlockSpec((row_tile, n_pad), a_map),     # A row tiles (streamed once)
            pl.BlockSpec((row_tile, f_pad), x_map),     # X row tiles (streamed once)
            pl.BlockSpec((f_pad, h_pad), const_map),    # W1 (resident)
            pl.BlockSpec((1, h_pad), const_map),        # b1
            pl.BlockSpec((h_pad, c_pad), const_map),    # W2 (resident)
            pl.BlockSpec((1, c_pad), const_map),        # b2 (dead lanes = -1e30)
        ],
        out_specs=pl.BlockSpec((row_tile, c_pad), out_map),
        scratch_shapes=[
            pltpu.VMEM((n_pad, n_pad), jnp.bfloat16),   # A_hat, resident for both layers
            pltpu.VMEM((n_pad, h_pad), jnp.bfloat16),   # X @ W1
            pltpu.VMEM((n_pad, c_pad), jnp.bfloat16),   # relu(A@XW1 + b1) @ W2
        ],
        compiler_params=pltpu.CompilerParams(
            # Phases are sequentially dependent and row tiles feed shared VMEM
            # scratch consumed by later phases -> both axes "arbitrary".
            dimension_semantics=("arbitrary", "arbitrary"),
            vmem_limit_bytes=int(vmem_limit),
        ),
    )(a_p, x_p, w1_p, b1_p, w2_p, b2_p)
    return out_pad[:num_nodes, :num_classes]


def build_normalized_adjacency(edge_index, num_nodes):
    """D^-1/2 (A + I) D^-1/2 as a dense f32 [N, N] matrix (improved=False).

    TODO(synk): PyG's gcn_norm uses edge_index as-is (duplicates accumulate,
    directed graphs stay asymmetric); we coalesce + symmetrize, which matches
    the usual undirected Planetoid setting.
    """
    row, col = edge_index
    a = jnp.zeros((num_nodes, num_nodes), jnp.float32)
    a = a.at[row, col].set(1.0)
    a = jnp.maximum(a, a.T)                      # symmetrize
    eye = jnp.eye(num_nodes, dtype=jnp.float32)
    a = a * (1.0 - eye) + eye                    # fresh self-loops, weight 1
    deg = jnp.sum(a, axis=1)
    d_inv_sqrt = jnp.where(deg > 0, jax.lax.rsqrt(deg), 0.0)
    return a * d_inv_sqrt[:, None] * d_inv_sqrt[None, :]


def prepare_padded_operands(a_hat, x, w1, b1, w2, b2, *, row_tile=256):
    """One-time padding/cast (hoisted out of the per-call path)."""
    n, f = x.shape
    h = w1.shape[1]
    c = w2.shape[1]
    n_pad = _round_up(max(n, row_tile), KPAD)    # contraction dim of aggregations
    f_pad = _round_up(f, KPAD)                   # contraction dim of X @ W1
    h_pad = _round_up(h, LANE)
    c_pad = _round_up(c, LANE)

    a_p = jnp.zeros((n_pad, n_pad), jnp.bfloat16).at[:n, :n].set(
        a_hat.astype(jnp.bfloat16))
    x_p = jnp.zeros((n_pad, f_pad), jnp.bfloat16).at[:n, :f].set(
        x.astype(jnp.bfloat16))
    w1_p = jnp.zeros((f_pad, h_pad), jnp.bfloat16).at[:f, :h].set(
        w1.astype(jnp.bfloat16))
    b1_p = jnp.zeros((1, h_pad), jnp.float32).at[:, :h].set(b1.reshape(1, -1))
    w2_p = jnp.zeros((h_pad, c_pad), jnp.bfloat16).at[:h, :c].set(
        w2.astype(jnp.bfloat16))
    # Finite large-negative bias on dead class lanes removes the in-kernel
    # log_softmax mask (keep it finite so z - max never produces inf - inf).
    b2_p = jnp.full((1, c_pad), -1e30, jnp.float32).at[:, :c].set(b2.reshape(1, -1))
    return a_p, x_p, w1_p, b1_p, w2_p, b2_p


def gcn_reference(x, a, w1, b1, w2, b2):
    """Pure-JAX f32 reference of Net.forward (eval mode)."""
    h = jnp.maximum(a @ (x @ w1) + b1, 0.0)
    z = a @ (h @ w2) + b2
    return jax.nn.log_softmax(z, axis=1)


def glorot(key, fan_in, fan_out):
    limit = jnp.sqrt(6.0 / (fan_in + fan_out))
    return jax.random.uniform(key, (fan_in, fan_out), jnp.float32, -limit, limit)


if __name__ == "__main__":
    # Small synthetic "Planetoid-like" graph.
    N_NODES = 48
    NUM_FEATURES = 16
    HIDDEN = 16
    NUM_CLASSES = 8
    NUM_EDGES = 96
    ROW_TILE = 128          # -> padded N = 256, 2 row tiles, grid = (3, 2)

    key = jax.random.PRNGKey(0)
    k_x, k_src, k_dst, k_w1, k_w2 = jax.random.split(key, 5)

    # Node features (row-normalized, mimicking T.NormalizeFeatures()).
    x = jax.random.uniform(k_x, (N_NODES, NUM_FEATURES), jnp.float32)
    x = x / jnp.maximum(jnp.sum(x, axis=1, keepdims=True), 1e-12)

    # Deterministic random edge_index [2, E].
    src = jax.random.randint(k_src, (NUM_EDGES,), 0, N_NODES)
    dst = jax.random.randint(k_dst, (NUM_EDGES,), 0, N_NODES)
    edge_index = jnp.stack([src, dst], axis=0)

    a_hat = build_normalized_adjacency(edge_index, N_NODES)

    # Deterministic parameters (GCNConv: glorot weight, zero bias).
    w1 = glorot(k_w1, NUM_FEATURES, HIDDEN)
    b1 = jnp.zeros((1, HIDDEN), jnp.float32)
    w2 = glorot(k_w2, HIDDEN, NUM_CLASSES)
    b2 = jnp.zeros((1, NUM_CLASSES), jnp.float32)

    # One-time padding / bf16 cast (hoisted out of the per-call path).
    a_p, x_p, w1_p, b1_p, w2_p, b2_p = prepare_padded_operands(
        a_hat, x, w1, b1, w2, b2, row_tile=ROW_TILE)

    fwd = jax.jit(functools.partial(
        gcn_forward, num_nodes=N_NODES, num_classes=NUM_CLASSES,
        row_tile=ROW_TILE))
    out = fwd(a_p, x_p, w1_p, b1_p, w2_p, b2_p)
    out = jax.block_until_ready(out)

    assert out.shape == (N_NODES, NUM_CLASSES)
    # log_softmax rows must sum (in prob space) to ~1.
    assert jnp.allclose(jnp.sum(jnp.exp(out), axis=1), 1.0, atol=1e-3)
    # Tolerance check against the f32 reference (bf16 MXU inputs, f32 accumulate).
    ref = gcn_reference(x, a_hat, w1, b1, w2, b2)
    assert jnp.max(jnp.abs(out - ref)) < 0.1
    print("KERNEL_OK")
</pallas_src>

<mosaic_0001>
module attributes {stable_mosaic.version = 11 : i64} {
  func.func @_fused_gcn_kernel(%arg0: i32, %arg1: i32, %arg2: memref<128x256xbf16, #tpu.memory_space<vmem>>, %arg3: memref<128x256xbf16, #tpu.memory_space<vmem>>, %arg4: memref<256x128xbf16, #tpu.memory_space<vmem>>, %arg5: memref<1x128xf32, #tpu.memory_space<vmem>>, %arg6: memref<128x128xbf16, #tpu.memory_space<vmem>>, %arg7: memref<1x128xf32, #tpu.memory_space<vmem>>, %arg8: memref<128x128xf32, #tpu.memory_space<vmem>>, %arg9: memref<256x256xbf16, #tpu.memory_space<vmem>>, %arg10: memref<256x128xbf16, #tpu.memory_space<vmem>>, %arg11: memref<256x128xbf16, #tpu.memory_space<vmem>>) attributes {dimension_semantics = [#tpu.dimension_semantics<arbitrary>, #tpu.dimension_semantics<arbitrary>], iteration_bounds = array<i64: 3, 2>, scalar_prefetch = 0 : i64, scratch_operands = 3 : i64, tpu.core_type = #tpu.core_type<tc>, window_params = [{transform_indices = @transform_0, window_bounds = array<i64: 128, 256>}, {transform_indices = @transform_1, window_bounds = array<i64: 128, 256>}, {pipeline_mode = #tpu.pipeline_mode<synchronous>, transform_indices = @transform_2, window_bounds = array<i64: 256, 128>}, {pipeline_mode = #tpu.pipeline_mode<synchronous>, transform_indices = @transform_3, window_bounds = array<i64: 1, 128>}, {pipeline_mode = #tpu.pipeline_mode<synchronous>, transform_indices = @transform_4, window_bounds = array<i64: 128, 128>}, {pipeline_mode = #tpu.pipeline_mode<synchronous>, transform_indices = @transform_5, window_bounds = array<i64: 1, 128>}, {transform_indices = @transform_6, window_bounds = array<i64: 128, 128>}]} {
    %c128_i32 = arith.constant 128 : i32
    %0 = arith.muli %arg1, %c128_i32 : i32
    %1 = tpu.assume_multiple %0, 128 : i32
    %c0_i32 = arith.constant 0 : i32
    %2 = arith.cmpi eq, %arg0, %c0_i32 : i32
    %3 = arith.extui %2 : i1 to i32
    %c0_i32_0 = arith.constant 0 : i32
    %4 = arith.cmpi ne, %3, %c0_i32_0 : i32
    scf.if %4 {
      %c0 = arith.constant 0 : index
      %c0_3 = arith.constant 0 : index
      %11 = vector.load %arg2[%c0, %c0_3] : memref<128x256xbf16, #tpu.memory_space<vmem>>, vector<128x256xbf16>
      %12 = arith.index_cast %1 : i32 to index
      %c0_4 = arith.constant 0 : index
      %13 = vector.load %arg9[%12, %c0_4] : memref<256x256xbf16, #tpu.memory_space<vmem>>, vector<128x256xbf16>
      tpu.vector_store %arg9[%12, %c0_4], %11 {strides = array<i32>} : memref<256x256xbf16, #tpu.memory_space<vmem>>, vector<128x256xbf16>,
      %c0_5 = arith.constant 0 : index
      %c0_6 = arith.constant 0 : index
      %14 = vector.load %arg3[%c0_5, %c0_6] : memref<128x256xbf16, #tpu.memory_space<vmem>>, vector<128x256xbf16>
      %c0_7 = arith.constant 0 : index
      %c0_8 = arith.constant 0 : index
      %15 = vector.load %arg4[%c0_7, %c0_8] : memref<256x128xbf16, #tpu.memory_space<vmem>>, vector<256x128xbf16>
      %cst = arith.constant dense<0.000000e+00> : vector<128x128xf32>
      %16 = tpu.matmul %14, %15, %cst {dimension_numbers = #tpu.dot_dimension_numbers<[1], [0], [0], [1], [0, 0, 1, 1], [], []>} : vector<128x256xbf16>, vector<256x128xbf16>, vector<128x128xf32> -> vector<128x128xf32>
      %17 = arith.truncf %16 : vector<128x128xf32> to vector<128x128xbf16>
      %18 = arith.index_cast %1 : i32 to index
      %c0_9 = arith.constant 0 : index
      %19 = vector.load %arg10[%18, %c0_9] : memref<256x128xbf16, #tpu.memory_space<vmem>>, vector<128x128xbf16>
      tpu.vector_store %arg10[%18, %c0_9], %17 {strides = array<i32>} : memref<256x128xbf16, #tpu.memory_space<vmem>>, vector<128x128xbf16>,
    } else {
    }
    %c1_i32 = arith.constant 1 : i32
    %5 = arith.cmpi eq, %arg0, %c1_i32 : i32
    %6 = arith.extui %5 : i1 to i32
    %c0_i32_1 = arith.constant 0 : i32
    %7 = arith.cmpi ne, %6, %c0_i32_1 : i32
    scf.if %7 {
      %11 = arith.index_cast %1 : i32 to index
      %c0 = arith.constant 0 : index
      %12 = vector.load %arg9[%11, %c0] : memref<256x256xbf16, #tpu.memory_space<vmem>>, vector<128x256xbf16>
      %c0_3 = arith.constant 0 : index
      %c0_4 = arith.constant 0 : index
      %13 = vector.load %arg10[%c0_3, %c0_4] : memref<256x128xbf16, #tpu.memory_space<vmem>>, vector<256x128xbf16>
      %cst = arith.constant dense<0.000000e+00> : vector<128x128xf32>
      %14 = tpu.matmul %12, %13, %cst {dimension_numbers = #tpu.dot_dimension_numbers<[1], [0], [0], [1], [0, 0, 1, 1], [], []>} : vector<128x256xbf16>, vector<256x128xbf16>, vector<128x128xf32> -> vector<128x128xf32>
      %c0_5 = arith.constant 0 : index
      %c0_6 = arith.constant 0 : index
      %15 = vector.load %arg5[%c0_5, %c0_6] : memref<1x128xf32, #tpu.memory_space<vmem>>, vector<1x128xf32>
      %16 = vector.broadcast %15 : vector<1x128xf32> to vector<128x128xf32>
      %17 = arith.addf %14, %16 : vector<128x128xf32>
      %cst_7 = arith.constant 0.000000e+00 : f32
      %18 = vector.broadcast %cst_7 : f32 to vector<128x128xf32>
      %19 = arith.maximumf %17, %18 : vector<128x128xf32>
      %20 = arith.truncf %19 : vector<128x128xf32> to vector<128x128xbf16>
      %c0_8 = arith.constant 0 : index
      %c0_9 = arith.constant 0 : index
      %21 = vector.load %arg6[%c0_8, %c0_9] : memref<128x128xbf16, #tpu.memory_space<vmem>>, vector<128x128xbf16>
      %cst_10 = arith.constant dense<0.000000e+00> : vector<128x128xf32>
      %22 = tpu.matmul %20, %21, %cst_10 {dimension_numbers = #tpu.dot_dimension_numbers<[1], [0], [0], [1], [0, 0, 1, 1], [], []>} : vector<128x128xbf16>, vector<128x128xbf16>, vector<128x128xf32> -> vector<128x128xf32>
      %23 = arith.truncf %22 : vector<128x128xf32> to vector<128x128xbf16>
      %24 = arith.index_cast %1 : i32 to index
      %c0_11 = arith.constant 0 : index
      %25 = vector.load %arg11[%24, %c0_11] : memref<256x128xbf16, #tpu.memory_space<vmem>>, vector<128x128xbf16>
      tpu.vector_store %arg11[%24, %c0_11], %23 {strides = array<i32>} : memref<256x128xbf16, #tpu.memory_space<vmem>>, vector<128x128xbf16>,
    } else {
    }
    %c2_i32 = arith.constant 2 : i32
    %8 = arith.cmpi eq, %arg0, %c2_i32 : i32
    %9 = arith.extui %8 : i1 to i32
    %c0_i32_2 = arith.constant 0 : i32
    %10 = arith.cmpi ne, %9, %c0_i32_2 : i32
    scf.if %10 {
      %11 = arith.index_cast %1 : i32 to index
      %c0 = arith.constant 0 : index
      %12 = vector.load %arg9[%11, %c0] : memref<256x256xbf16, #tpu.memory_space<vmem>>, vector<128x256xbf16>
      %c0_3 = arith.constant 0 : index
      %c0_4 = arith.constant 0 : index
      %13 = vector.load %arg11[%c0_3, %c0_4] : memref<256x128xbf16, #tpu.memory_space<vmem>>, vector<256x128xbf16>
      %cst = arith.constant dense<0.000000e+00> : vector<128x128xf32>
      %14 = tpu.matmul %12, %13, %cst {dimension_numbers = #tpu.dot_dimension_numbers<[1], [0], [0], [1], [0, 0, 1, 1], [], []>} : vector<128x256xbf16>, vector<256x128xbf16>, vector<128x128xf32> -> vector<128x128xf32>
      %c0_5 = arith.constant 0 : index
      %c0_6 = arith.constant 0 : index
      %15 = vector.load %arg7[%c0_5, %c0_6] : memref<1x128xf32, #tpu.memory_space<vmem>>, vector<1x128xf32>
      %16 = vector.broadcast %15 : vector<1x128xf32> to vector<128x128xf32>
      %17 = arith.addf %14, %16 : vector<128x128xf32>
      %cst_7 = arith.constant dense<0xFF800000> : vector<128xf32>
      %18 = vector.multi_reduction <maximumf>, %17, %cst_7 [1] : vector<128x128xf32> to vector<128xf32>
      %19 = vector.shape_cast %18 : vector<128xf32> to vector<128x1xf32>
      %20 = vector.broadcast %19 : vector<128x1xf32> to vector<128x128xf32>
      %21 = arith.subf %17, %20 : vector<128x128xf32>
      %22 = math.exp %21 : vector<128x128xf32>
      %cst_8 = arith.constant dense<0.000000e+00> : vector<128xf32>
      %23 = vector.multi_reduction <add>, %22, %cst_8 [1] : vector<128x128xf32> to vector<128xf32>
      %24 = vector.shape_cast %23 : vector<128xf32> to vector<128x1xf32>
      %25 = math.log %24 : vector<128x1xf32>
      %26 = vector.broadcast %19 : vector<128x1xf32> to vector<128x128xf32>
      %27 = arith.subf %17, %26 : vector<128x128xf32>
      %28 = vector.broadcast %25 : vector<128x1xf32> to vector<128x128xf32>
      %29 = arith.subf %27, %28 : vector<128x128xf32>
      %c0_9 = arith.constant 0 : index
      %c0_10 = arith.constant 0 : index
      %30 = vector.load %arg8[%c0_9, %c0_10] : memref<128x128xf32, #tpu.memory_space<vmem>>, vector<128x128xf32>
      tpu.vector_store %arg8[%c0_9, %c0_10], %29 {strides = array<i32>} : memref<128x128xf32, #tpu.memory_space<vmem>>, vector<128x128xf32>,
    } else {
    }
    return
  }
  func.func @transform_0(%arg0: i32, %arg1: i32) -> (i32, i32) {
    %c0_i32 = arith.constant 0 : i32
    %0 = arith.cmpi eq, %arg0, %c0_i32 : i32
    %c1_i32 = arith.constant 1 : i32
    %1 = arith.select %0, %arg1, %c1_i32 : i32
    %c0_i32_0 = arith.constant 0 : i32
    %c0_i32_1 = arith.constant 0 : i32
    return %1, %c0_i32_0 : i32, i32
  }
  func.func @transform_1(%arg0: i32, %arg1: i32) -> (i32, i32) {
    %c0_i32 = arith.constant 0 : i32
    %0 = arith.cmpi eq, %arg0, %c0_i32 : i32
    %c1_i32 = arith.constant 1 : i32
    %1 = arith.select %0, %arg1, %c1_i32 : i32
    %c0_i32_0 = arith.constant 0 : i32
    %c0_i32_1 = arith.constant 0 : i32
    return %1, %c0_i32_0 : i32, i32
  }
  func.func @transform_2(%arg0: i32, %arg1: i32) -> (i32, i32) {
    %c0_i32 = arith.constant 0 : i32
    %c0_i32_0 = arith.constant 0 : i32
    %c0_i32_1 = arith.constant 0 : i32
    return %c0_i32, %c0_i32_0 : i32, i32
  }
  func.func @transform_3(%arg0: i32, %arg1: i32) -> (i32, i32) {
    %c0_i32 = arith.constant 0 : i32
    %c0_i32_0 = arith.constant 0 : i32
    %c0_i32_1 = arith.constant 0 : i32
    return %c0_i32, %c0_i32_0 : i32, i32
  }
  func.func @transform_4(%arg0: i32, %arg1: i32) -> (i32, i32) {
    %c0_i32 = arith.constant 0 : i32
    %c0_i32_0 = arith.constant 0 : i32
    %c0_i32_1 = arith.constant 0 : i32
    return %c0_i32, %c0_i32_0 : i32, i32
  }
  func.func @transform_5(%arg0: i32, %arg1: i32) -> (i32, i32) {
    %c0_i32 = arith.constant 0 : i32
    %c0_i32_0 = arith.constant 0 : i32
    %c0_i32_1 = arith.constant 0 : i32
    return %c0_i32, %c0_i32_0 : i32, i32
  }
  func.func @transform_6(%arg0: i32, %arg1: i32) -> (i32, i32) {
    %c2_i32 = arith.constant 2 : i32
    %0 = arith.cmpi eq, %arg0, %c2_i32 : i32
    %c0_i32 = arith.constant 0 : i32
    %1 = arith.select %0, %arg1, %c0_i32 : i32
    %c0_i32_0 = arith.constant 0 : i32
    %c0_i32_1 = arith.constant 0 : i32
    return %1, %c0_i32_0 : i32, i32
  }
}

</mosaic_0001>

<bundles_post_ra>
// kernel: gcn_forward.1
= control target key start
LH: loop header
LB: loop body
LE: loop exit
PB: predicated region body
PF: predicated region fallthrough
CT: control target
= control target key end

     0   :  { %s3055_s0 = inlined_call_operand.hbm [shape: bf16[256,256], index: 0, kind: input, shape index: {}]   ;;  %s3056_s1 = inlined_call_operand.hbm [shape: bf16[256,256], index: 1, kind: input, shape index: {}]   ;;  %s3057_s2 = inlined_call_operand.hbm [shape: bf16[256,128], index: 2, kind: input, shape index: {}]   ;;  %s3058_s3 = inlined_call_operand.vmem [shape: f32[1,128], index: 3, kind: input, shape index: {}]   ;;  %s3059_s4 = inlined_call_operand.hbm [shape: bf16[128,128], index: 4, kind: input, shape index: {}]   ;;  %s3060_s5 = inlined_call_operand.vmem [shape: f32[1,128], index: 5, kind: input, shape index: {}]   ;;  %s3061_s6 = inlined_call_operand.vmem [shape: f32[256,128], index: 6, kind: output, shape index: {}]  }
   0x1   :  { %3071 = sst [smem:[#allocation19_spill]] %s3055_s0 }
   0x2   :  { %3072 = sst [smem:[#allocation20_spill]] %s3057_s2 }
   0x3   :  { %3073 = sst [smem:[#allocation21_spill]] %s3059_s4 }
   0x4   :  { %11 = vsyncpa [#allocation6], 0 }
   0x5   :  { %13 = vsyncpa [#allocation6 + $0x1], 0 }
   0x6   :  { %14 = vsyncpa [#allocation8], 0 }
   0x7   :  { %16 = vsyncpa [#allocation8 + $0x1], 0 }
   0x8   :  { %17 = vsyncpa [#allocation11], 0  ;;  %s2500_s21 = smov 0   ;;  %s2502_s22 = smov 0  }
   0x9   :  { %s2504_s23 = smov 0   ;;  %s2506_s24 = smov 0  }
   0xa   :  { %s2508_s25 = smov 0   ;;  %s2510_s26 = smov 0  }
   0xb   :  { %s2512_s27 = smov 0   ;;  %s2514_s28 = smov 0  }
   0xc LB: > { %3074 = sst [smem:[#allocation16_spill]] %s2451_s27  ;;  %s3066_s29 = sadd.s32 4294967295, %s2455_s28   ;;  %s2455_s28 = sphi %s2514_s28, %s23_s28   ;;  %s2451_s27 = sphi %s2512_s27, %s3092_s27   ;;  %s2447_s26 = sphi %s2510_s26, %s3097_s26   ;;  %s2443_s25 = sphi %s2508_s25, %s3090_s25   ;;  %s2439_s24 = sphi %s2506_s24, %s3096_s24   ;;  %s2435_s23 = sphi %s2504_s23, %s3095_s23   ;;  %s2431_s22 = sphi %s2502_s22, %s3094_s22   ;;  %s2427_s21 = sphi %s2500_s21, %s3093_s21  }
   0xd   : > { %p59_p0 = scmp.ne.s32.totalorder %s2431_s22, %s2427_s21  ;;  %p2542_p1 = scmp.eq.s32.totalorder %s3066_s29, 0 }
   0xe   : > { %p1654_p2 = scmp.ge.s32.totalorder %s2455_s28, 1  ;;  %p214_p3 = scmp.lt.s32.totalorder %s2455_s28, 7 }
   0xf   : > { %s3075_s30 = scalar_select %p2542_p1, 1, 0 }
  0x10   : > { %p2550_p4 = por %p2542_p1, %p59_p0  ;;  %p2554_p5 = pnand %p1654_p2, %p214_p3 }
  0x11   : > { %s2457_s9 = smov [#allocation9]   ;;  %s2458_s12 = smov [#allocation10]  }
  0x12   : > { %s3076_s7 = scalar_select %p2550_p4, 1, 0 }
  0x13   : > { %s3077_s8 = scalar_select %p2554_p5, 1, 0 }
  0x14   : > { %s226_s10 = sshll.u32 %s2457_s9, 4  ;;  %p2036_p6 = pneg %p2554_p5  ;;  %s227_s10 = int_to_ptr.vmem [resolvable:$true] %s226_s10 }
  0x15   : > { %s242_s13 = sshll.u32 %s2458_s12, 4  ;;  %s3079_s2 = sld [smem:[#allocation20_spill]]  ;;  %s2566_s13 = int_to_ptr.vmem [resolvable:$true] %s242_s13 }
  0x16   : > { %p2562_p7 = pnand %p2036_p6, %p2542_p1 }
  0x18   : > { %p2263_p9 = pneg %p2562_p7 }
  0x1b   : > { %s2261_s16 = scalar_lea.hbm %s3079_s2, 2048 }
  0x1c   : > { %p2262_p8 = scmp.ne.s32.totalorder %s3079_s2, %s2261_s16  ;;  %p2268_p12 = scmp.lt.u32.totalorder %s2261_s16, %s3079_s2 }
  0x1e   : > { %p2264_p10 = pnand %p2263_p9, %p2262_p8 }
  0x20   : > { %p2265_p11 = pneg %p2264_p10 }
  0x22   : > { %p2270_p13 = pnand %p2268_p12, %p2265_p11 }
  0x24   : > { %2273 = shalt.err (!%p2270_p13)
}
  0x25   : > { %s2274_s21 = scalar_lea.vmem %s227_s10, 2048  ;;  %p2282_p6 = scmp.lt.s32.totalorder %s227_s10, %s227_s10 }
  0x26   : > { %p2275_p0 = scmp.ne.s32.totalorder %s227_s10, %s2274_s21  ;;  %p2283_p1 = scmp.lt.s32.totalorder %s2274_s21, %s2274_s21 }
  0x28   : > { %p2277_p2 = pnand %p2275_p0, %p2263_p9  ;;  %p2284_p4 = por %p2283_p1, %p2282_p6 }
  0x2a   : > { %p2278_p3 = pneg %p2277_p2 }
  0x2c   : > { %p2285_p5 = pnand %p2284_p4, %p2278_p3 }
  0x2e   : > { %2288 = shalt.err (!%p2285_p5)
}
  0x2f   : > { %s2459_s9 = smov 64   ;;  %s2460_s12 = smov 4  }
  0x30   : > { %2039 = dma.hbm_to_vmem [thread:$0]  (!%p2562_p7), %s3079_s2, 2048, %s227_s10, [#allocation8], %s2459_s9, %s2459_s9, %s2460_s12  }
  0x31   : > { %s3080_s4 = sld [smem:[#allocation21_spill]] }
  0x37   : > { %s2289_s18 = scalar_lea.hbm %s3080_s4, 1024 }
  0x38   : > { %p2290_p8 = scmp.ne.s32.totalorder %s3080_s4, %s2289_s18  ;;  %p2296_p5 = scmp.lt.u32.totalorder %s2289_s18, %s3080_s4 }
  0x3a   : > { %p2292_p1 = pnand %p2290_p8, %p2263_p9 }
  0x3c   : > { %p2293_p4 = pneg %p2292_p1 }
  0x3e   : > { %p2298_p10 = pnand %p2296_p5, %p2293_p4 }
  0x40   : > { %2301 = shalt.err (!%p2298_p10)
}
  0x41   : > { %s2302_s10 = scalar_lea.vmem %s2566_s13, 1024  ;;  %p2310_p0 = scmp.lt.s32.totalorder %s2566_s13, %s2566_s13 }
  0x42   : > { %p2303_p11 = scmp.ne.s32.totalorder %s2566_s13, %s2302_s10  ;;  %p2311_p2 = scmp.lt.s32.totalorder %s2302_s10, %s2302_s10 }
  0x44   : > { %p2305_p12 = pnand %p2303_p11, %p2263_p9  ;;  %p2312_p3 = por %p2311_p2, %p2310_p0 }
  0x46   : > { %p2306_p13 = pneg %p2305_p12 }
  0x48   : > { %p2313_p6 = pnand %p2312_p3, %p2306_p13 }
  0x4a   : > { %2316 = shalt.err (!%p2313_p6)
}
  0x4b   : > { %2042 = dma.hbm_to_vmem [thread:$0]  (!%p2562_p7), %s3080_s4, 1024, %s2566_s13, [#allocation11], %s2459_s9, %s2459_s9, %s2460_s12  }
  0x4c   : > { %s32_s15 = sadd.s32 1, %s2447_s26  ;;  %s35_s16 = sadd.s32 1, %s2451_s27 }
  0x4d   : > { %p33_p9 = scmp.ge.s32.totalorder %s32_s15, 2  ;;  %p39_p8 = scmp.eq.s32.totalorder %s2451_s27, 0 }
  0x4e   : > { %s46_s11 = sadd.s32 1, %s2435_s23  ;;  %p53_p1 = scmp.ne.s32.totalorder %s2435_s23, %s2431_s22 }
  0x4f   : > { %s3099_s15 = smov (%p33_p9, %s32_s15), 0  ;;  %s3101_s16 = smov (!%p33_p9, %s35_s16), %s2451_s27 }
  0x50   : > { %3081 = sst [smem:[#allocation17_spill]] %s3099_s15  ;;  %p37_p4 = scmp.ge.s32.totalorder %s3101_s16, 3 }
  0x51   : > { %s2625_s17 = scalar_select %p39_p8, %s2447_s26, 1 }
  0x52   : > { %p54_p5 = scmp.eq.s32.totalorder %s2455_s28, 0  ;;  %p2052_p7 = scmp.lt.s32.totalorder %s2455_s28, 6 }
  0x53   : > { %s259_s13 = sand.u32 1, %s2435_s23   ;;  %s3103_s16 = smov (%p37_p4, %s3101_s16), 0 }
  0x54   : > { %3082 = sst [smem:[#allocation18_spill]] %s3103_s16  ;;  %p55_p10 = por %p54_p5, %p53_p1 }
  0x55   : > { %p41_p11 = scmp.eq.s32.totalorder %s3103_s16, 0  ;;  %s2633_s9 = sshll.u32 %s259_s13, 7 }
  0x56   : > { %s3067_s12 = sshll.u32 %s2625_s17, 11  ;;  %s3083_s0 = sld [smem:[#allocation19_spill]] }
  0x57   : > { %s42_s18 = scalar_select %p41_p11, %s3099_s15, 1 }
  0x58   : > { %s263_s10 = scalar_lea.vmem [#allocation5], %s2633_s9  ;;  %p2650_p13 = pnand %p2052_p7, %p55_p10 }
  0x59   : > { %s273_s29 = sshll.u32 %s263_s10, 4  ;;  %s43_s14 = ssub.s32 %s2625_s17, %s42_s18  ;;  %s2646_s29 = int_to_ptr.vmem [resolvable:$true] %s273_s29 }
  0x5a   : > { %p44_p12 = scmp.eq.s32.totalorder %s43_s14, 0  ;;  %s2657_s20 = scalar_lea.sflag [#allocation6], %s259_s13 }
  0x5b   : > { %p2319_p2 = pneg %p2650_p13 }
  0x5c   : > { %s2642_s21 = scalar_lea.hbm %s3083_s0, %s3067_s12  ;;  %s2322_s14 = scalar_lea.hbm %s3083_s0, 4096 }
  0x5d   : > { %s2655_s19 = scalar_select %p44_p12, %s2435_s23, %s46_s11  }
  0x5e   : > { %s2317_s12 = scalar_lea.hbm %s2642_s21, 2048  ;;  %p2323_p9 = scmp.lt.u32.totalorder %s2642_s21, %s3083_s0 }
  0x5f   : > { %p2318_p0 = scmp.ne.s32.totalorder %s2642_s21, %s2317_s12  ;;  %p2324_p8 = scmp.lt.u32.totalorder %s2322_s14, %s2317_s12 }
  0x60   : > { %p2326_p4 = scmp.lt.u32.totalorder %s2317_s12, %s2642_s21 }
  0x61   : > { %p2320_p3 = pnand %p2319_p2, %p2318_p0  ;;  %p2325_p1 = por %p2324_p8, %p2323_p9 }
  0x63   : > { %p2321_p6 = pneg %p2320_p3  ;;  %p2327_p5 = por %p2326_p4, %p2325_p1 }
  0x65   : > { %p2328_p7 = pnand %p2327_p5, %p2321_p6 }
  0x67   : > { %2331 = shalt.err (!%p2328_p7)
}
  0x68   : > { %s2332_s11 = scalar_lea.vmem %s2646_s29, 2048  ;;  %s2461_s13 = smov [#allocation5]  }
  0x69   : > { %p2333_p10 = scmp.ne.s32.totalorder %s2646_s29, %s2332_s11  ;;  %s2337_s18 = sshll.u32 %s2461_s13, 4  ;;  %s2338_s18 = int_to_ptr.vmem [resolvable:$false] %s2337_s18 }
  0x6a   : > { %s2339_s4 = scalar_lea.vmem %s2338_s18, 4096  ;;  %p2340_p0 = scmp.lt.s32.totalorder %s2646_s29, %s2338_s18 }
  0x6b   : > { %p2335_p11 = pnand %p2333_p10, %p2319_p2  ;;  %p2341_p3 = scmp.lt.s32.totalorder %s2339_s4, %s2332_s11 }
  0x6d   : > { %p2336_p12 = pneg %p2335_p11  ;;  %p2342_p9 = por %p2341_p3, %p2340_p0 }
  0x6f   : > { %p2343_p8 = pnand %p2342_p9, %p2336_p12 }
  0x71   : > { %2346 = shalt.err (!%p2343_p8)
}
  0x72   : > { %s2462_s16 = smov 128   ;;  %s2463_s12 = smov 8  }
  0x73   : > { %2046 = dma.hbm_to_vmem [thread:$0]  (!%p2650_p13), %s2642_s21, 2048, %s2646_s29, %s2657_s20, %s2462_s16, %s2462_s16, %s2463_s12  }
  0x74   : > { %s3085_s10 = sshll.u32 %s2625_s17, 11  ;;  %s287_s18 = scalar_lea.vmem [#allocation7], %s2633_s9 }
  0x75   : > { %s2693_s13 = scalar_lea.hbm %s3056_s1, %s3085_s10  ;;  %s297_s4 = sshll.u32 %s287_s18, 4  ;;  %s2696_s4 = int_to_ptr.vmem [resolvable:$true] %s297_s4 }
  0x76   : > { %s283_s0 = sand.u32 1, %s2455_s28   ;;  %s2347_s27 = scalar_lea.hbm %s2693_s13, 2048 }
  0x77   : > { %s2699_s15 = scalar_lea.sflag [#allocation8], %s283_s0  ;;  %p2348_p6 = scmp.ne.s32.totalorder %s2693_s13, %s2347_s27 }
  0x78   : > { %s2352_s29 = scalar_lea.hbm %s3056_s1, 4096  ;;  %p2353_p5 = scmp.lt.u32.totalorder %s2693_s13, %s3056_s1 }
  0x79   : > { %p2350_p1 = pnand %p2348_p6, %p2319_p2  ;;  %p2354_p7 = scmp.lt.u32.totalorder %s2352_s29, %s2347_s27 }
  0x7a   : > { %p2356_p11 = scmp.lt.u32.totalorder %s2347_s27, %s2693_s13 }
  0x7b   : > { %p2351_p4 = pneg %p2350_p1  ;;  %p2355_p10 = por %p2354_p7, %p2353_p5 }
  0x7d   : > { %p2357_p12 = por %p2356_p11, %p2355_p10 }
  0x7f   : > { %p2358_p0 = pnand %p2357_p12, %p2351_p4 }
  0x81   : > { %2361 = shalt.err (!%p2358_p0)
}
  0x82   : > { %s2362_s0 = scalar_lea.vmem %s2696_s4, 2048  ;;  %s2464_s9 = smov [#allocation7]  }
  0x83   : > { %p2363_p3 = scmp.ne.s32.totalorder %s2696_s4, %s2362_s0  ;;  %s2367_s14 = sshll.u32 %s2464_s9, 4  ;;  %s2368_s14 = int_to_ptr.vmem [resolvable:$false] %s2367_s14 }
  0x84   : > { %s2369_s11 = scalar_lea.vmem %s2368_s14, 4096  ;;  %p2370_p6 = scmp.lt.s32.totalorder %s2696_s4, %s2368_s14 }
  0x85   : > { %p2365_p9 = pnand %p2363_p3, %p2319_p2  ;;  %p2371_p1 = scmp.lt.s32.totalorder %s2369_s11, %s2362_s0 }
  0x87   : > { %p2366_p8 = pneg %p2365_p9  ;;  %p2372_p5 = por %p2371_p1, %p2370_p6 }
  0x89   : > { %p2373_p7 = pnand %p2372_p5, %p2366_p8 }
  0x8b   : > { %2376 = shalt.err (!%p2373_p7)
}
  0x8c   : > { %2049 = dma.hbm_to_vmem [thread:$0]  (!%p2650_p13), %s2693_s13, 2048, %s2696_s4, %s2699_s15, %s2462_s16, %s2462_s16, %s2463_s12  }
  0x8d   : > { %p3086_p2 = scmp.ne.s32.totalorder %s3077_s8, 0 }
  0x8e   : > { %s311_s27 = sand.u32 (!%p3086_p2), 1, %s2431_s22   ;;  %p3087_p4 = scmp.ne.s32.totalorder (!%p3086_p2), %s3076_s7, 0 }
  0x8f   : > { %309 = sbr.rel (%p3086_p2) target bundleno = 1590 (0x636), region = 44  ;;  %s1667_s18 = sshll.u32 (!%p3086_p2), %s311_s27, 7 }
  0x90   : > { %s312_s17 = scalar_lea.sflag (!%p3086_p2), [#allocation6], %s311_s27  ;;  %s2731_s21 = scalar_lea.vmem (!%p3086_p2), [#allocation5], %s1667_s18 }
  0x96   : > { %2410 = dma.done.wait (%p3087_p4), %s312_s17, 2048  }
  0x97   : > { %2412 = vsyncadd (%p3087_p4), %s312_s17, 4294965248  ;;  %s3088_s2 = sadd.s32 4294967295, %s2455_s28   ;;  %s2739_s16 = scalar_lea.vmem [#allocation7], %s1667_s18 }
  0x98   : > { %s320_s29 = sand.u32 1, %s3088_s2  }
  0x99   : > { %s321_s15 = scalar_lea.sflag [#allocation8], %s320_s29 }
  0x9a   : > { %2414 = dma.done.wait (%p3087_p4), %s321_s15, 2048  }
  0x9b   : > { %2416 = vsyncadd (%p3087_p4), %s321_s15, 4294965248  ;;  %p3089_p13 = scmp.ne.s32.totalorder %s3075_s30, 0 }
  0x9d   : > { %2418 = dma.done.wait (%p3089_p13), [#allocation8], 2048  }
  0x9e   : > { %2420 = vsyncadd (%p3089_p13), [#allocation8], 4294965248 }
  0x9f   : > { %2422 = dma.done.wait (%p3089_p13), [#allocation11], 1024  }
  0xa0   : > { %2424 = vsyncadd (%p3089_p13), [#allocation11], 4294966272  ;;  %p374_p10 = scmp.eq.s32.totalorder %s2443_s25, 2  ;;  %s2755_s8 = sshll.u32 %s2439_s24, 7 }
  0xa1   : > { %p1674_p12 = scmp.ne.s32.totalorder %s2443_s25, 0 }
  0xa2   : > { %s3105_s24 = smov (!%p374_p10, %s2439_s24), 0  ;;  %v2125_v0 = vld [vmem:[%s2731_s21] ss:$8 sps:$4 sm:$0xff] (!%p1674_p12)   ;;  %v2127_v1 = vld [vmem:[%s2731_s21 + $0x4] ss:$8 sps:$4 sm:$0xff] (!%p1674_p12)   ;;  %v2153_v20 = vld [vmem:[#allocation9 + $0x50] sm:$0xff] (!%p1674_p12)  }
  0xa3   : > { %s1671_s7 = sshll.u32 %s3105_s24, 4  ;;  %389 = sbr.rel (%p1674_p12) target bundleno = 446 (0x1be), region = 64  ;;  %v2128_v2 = vld [vmem:[%s2731_s21 + $0x10] ss:$8 sps:$4 sm:$0xff] (!%p1674_p12)   ;;  %v2130_v3 = vld [vmem:[%s2731_s21 + $0x14] ss:$8 sps:$4 sm:$0xff] (!%p1674_p12)  }
  0xa4   : > { %p377_p11 = scmp.lt.s32.totalorder %s1671_s7, 31  ;;  %v2131_v4 = vld [vmem:[%s2731_s21 + $0x20] ss:$8 sps:$4 sm:$0xff] (!%p1674_p12)   ;;  %v2133_v5 = vld [vmem:[%s2731_s21 + $0x24] ss:$8 sps:$4 sm:$0xff] (!%p1674_p12)   ;;  %s490_s24 = scalar_lea.vmem (!%p1674_p12), [#allocation2], %s2755_s8 }
  0xa5   : > { %v2134_v6 = vld [vmem:[%s2731_s21 + $0x30] ss:$8 sps:$4 sm:$0xff] (!%p1674_p12)   ;;  %v2136_v7 = vld [vmem:[%s2731_s21 + $0x34] ss:$8 sps:$4 sm:$0xff] (!%p1674_p12)   ;;  %491 = vst [vmem:[%s490_s24] sm:$0xff] (!%p1674_p12), %v2125_v0  ;;  %492 = vst [vmem:[%s490_s24 + $0x8] sm:$0xff] (!%p1674_p12), %v2127_v1  ;;  %s486_s30 = sshra.s32 (!%p1674_p12), %s2755_s8, 4 }
  0xa6   : > { %s3107_s7 = smov (!%p377_p11, %s1671_s7), 31  ;;  %v2137_v8 = vld [vmem:[%s2731_s21 + $0x40] ss:$8 sps:$4 sm:$0xff] (!%p1674_p12)   ;;  %v2139_v9 = vld [vmem:[%s2731_s21 + $0x44] ss:$8 sps:$4 sm:$0xff] (!%p1674_p12)   ;;  %493 = vst [vmem:[%s490_s24 + $0x10] sm:$0xff] (!%p1674_p12), %v2128_v2 }
  0xa7   : > { %s1672_s12 = sshll.u32 %s3107_s7, 3  ;;  %v2140_v10 = vld [vmem:[%s2731_s21 + $0x50] ss:$8 sps:$4 sm:$0xff] (!%p1674_p12)   ;;  %494 = vst [vmem:[%s490_s24 + $0x18] sm:$0xff] (!%p1674_p12), %v2130_v3  ;;  %495 = vst [vmem:[%s490_s24 + $0x20] sm:$0xff] (!%p1674_p12), %v2131_v4  ;;  %v2149_v16 = vld [vmem:[#allocation9 + $0x40] sm:$0xff] (!%p1674_p12)  }
  0xa8   : > { %s2761_s20 = scalar_lea.vmem %s3061_s6, %s1672_s12  ;;  %v2142_v11 = vld [vmem:[%s2731_s21 + $0x54] ss:$8 sps:$4 sm:$0xff] (!%p1674_p12)   ;;  %v2143_v12 = vld [vmem:[%s2731_s21 + $0x60] ss:$8 sps:$4 sm:$0xff] (!%p1674_p12)   ;;  %v2145_v13 = vld [vmem:[%s2731_s21 + $0x64] ss:$8 sps:$4 sm:$0xff] (!%p1674_p12)   ;;  %1752 = vmatprep.subr.bf16.mxu0 (!%p1674_p12), %v2149_v16  ;;  %1992 = vmatprep.subr.bf16.mxu1 (!%p1674_p12), %v2149_v16 }
  0xa9   : > { %496 = vst [vmem:[%s490_s24 + $0x28] sm:$0xff] (!%p1674_p12), %v2133_v5  ;;  %497 = vst [vmem:[%s490_s24 + $0x30] sm:$0xff] (!%p1674_p12), %v2134_v6  ;;  %v2146_v14 = vld [vmem:[%s2731_s21 + $0x70] ss:$8 sps:$4 sm:$0xff] (!%p1674_p12)   ;;  %v2148_v15 = vld [vmem:[%s2731_s21 + $0x74] ss:$8 sps:$4 sm:$0xff] (!%p1674_p12)  }
  0xaa   : > { %498 = vst [vmem:[%s490_s24 + $0x38] sm:$0xff] %v2136_v7  ;;  %499 = vst [vmem:[%s490_s24 + $0x40] sm:$0xff] %v2137_v8  ;;  %v2150_v17 = vld [vmem:[#allocation9] sm:$0xff]   ;;  %v2151_v18 = vld [vmem:[#allocation9 + $0x48] sm:$0xff]   ;;  %s1725_s10 = sshll.u32 %s486_s30, 3 }
  0xab   : > { %500 = vst [vmem:[%s490_s24 + $0x48] sm:$0xff] %v2139_v9  ;;  %501 = vst [vmem:[%s490_s24 + $0x50] sm:$0xff] %v2140_v10  ;;  %1753 = vmatpush3.bf16.msra.mxu0 %v2150_v17  ;;  %2000 = vmatpush3.bf16.msra.mxu1 %v2150_v17  ;;  %v2152_v19 = vld [vmem:[#allocation9 + $0x8] sm:$0xff]   ;;  %v2154_v21 = vld [vmem:[#allocation9 + $0x10] sm:$0xff]   ;;  %s2798_s0 = scalar_lea.vmem [#allocation3], %s1725_s10 }
  0xac   : > { %502 = vst [vmem:[%s490_s24 + $0x58] sm:$0xff] %v2142_v11  ;;  %503 = vst [vmem:[%s490_s24 + $0x60] sm:$0xff] %v2143_v12  ;;  %1754 = vmatprep.subr.bf16.mxu0 %v2151_v18  ;;  %1993 = vmatprep.subr.bf16.mxu1 %v2151_v18  ;;  %v2155_v22 = vld [vmem:[#allocation9 + $0x58] sm:$0xff]   ;;  %v2157_v24 = vld [vmem:[#allocation9 + $0x60] sm:$0xff]  }
  0xad   : > { %504 = vst [vmem:[%s490_s24 + $0x68] sm:$0xff] %v2145_v13  ;;  %505 = vst [vmem:[%s490_s24 + $0x70] sm:$0xff] %v2146_v14  ;;  %v2156_v23 = vld [vmem:[#allocation9 + $0x18] sm:$0xff]   ;;  %v2158_v25 = vld [vmem:[#allocation9 + $0x20] sm:$0xff]  }
  0xae   : > { %506 = vst [vmem:[%s490_s24 + $0x78] sm:$0xff] %v2148_v15  ;;  %v2159_v26 = vld [vmem:[#allocation9 + $0x68] sm:$0xff]   ;;  %v2161_v30 = vld [vmem:[#allocation9 + $0x70] sm:$0xff]   ;;  %v2163_v32 = vld [vmem:[#allocation9 + $0x78] sm:$0xff]  }
  0xaf   : > { %1755 = vmatpush3.bf16.msra.mxu0 %v2152_v19  ;;  %2001 = vmatpush3.bf16.msra.mxu1 %v2152_v19  ;;  %v2167_v27 = vld [vmem:[%s2739_s16 + $0x4] ss:$8 sps:$4 sm:$0xff]   ;;  %v2162_v31 = vld [vmem:[#allocation9 + $0x30] sm:$0xff]   ;;  %v2164_v33 = vld [vmem:[#allocation9 + $0x38] sm:$0xff]  }
  0xb0   : > { %1756 = vmatprep.subr.bf16.mxu0 %v2153_v20  ;;  %1994 = vmatprep.subr.bf16.mxu1 %v2153_v20  ;;  %v2170_v28 = vld [vmem:[%s2739_s16 + $0x44] ss:$8 sps:$4 sm:$0xff]   ;;  %v2165_v34 = vld [vmem:[%s2739_s16] ss:$8 sps:$4 sm:$0xff]   ;;  %v2171_v36 = vld [vmem:[%s2739_s16 + $0x14] ss:$8 sps:$4 sm:$0xff]  }
  0xb1   : > { %763 = vmatprep.mubr.bf16.mxu0 %v2167_v27  ;;  %v2160_v29 = vld [vmem:[#allocation9 + $0x28] sm:$0xff]   ;;  %795 = vmatprep.mubr.bf16.mxu1 %v2170_v28  ;;  %v2173_v37 = vld [vmem:[%s2739_s16 + $0x54] ss:$8 sps:$4 sm:$0xff]   ;;  %v2175_v38 = vld [vmem:[%s2739_s16 + $0x10] ss:$8 sps:$4 sm:$0xff]  }
  0xb2   : > { %v2168_v35 = vld [vmem:[%s2739_s16 + $0x40] ss:$8 sps:$4 sm:$0xff]   ;;  %v2176_v39 = vld [vmem:[%s2739_s16 + $0x50] ss:$8 sps:$4 sm:$0xff]   ;;  %v2177_v40 = vld [vmem:[%s2739_s16 + $0x24] ss:$8 sps:$4 sm:$0xff]  }
  0xb3   : > { %1757 = vmatpush3.bf16.msra.mxu0 %v2154_v21  ;;  %2002 = vmatpush3.bf16.msra.mxu1 %v2154_v21  ;;  %v2179_v41 = vld [vmem:[%s2739_s16 + $0x64] ss:$8 sps:$4 sm:$0xff]   ;;  %v2181_v42 = vld [vmem:[%s2739_s16 + $0x20] ss:$8 sps:$4 sm:$0xff]   ;;  %v2183_v44 = vld [vmem:[%s2739_s16 + $0x34] ss:$8 sps:$4 sm:$0xff]  }
  0xb4   : > { %1758 = vmatprep.subr.bf16.mxu0 %v2155_v22  ;;  %1995 = vmatprep.subr.bf16.mxu1 %v2155_v22  ;;  %v2182_v43 = vld [vmem:[%s2739_s16 + $0x60] ss:$8 sps:$4 sm:$0xff]   ;;  %v2185_v45 = vld [vmem:[%s2739_s16 + $0x74] ss:$8 sps:$4 sm:$0xff]   ;;  %v2187_v46 = vld [vmem:[%s2739_s16 + $0x30] ss:$8 sps:$4 sm:$0xff]  }
  0xb5   : > { %v2188_v47 = vld [vmem:[%s2739_s16 + $0x70] ss:$8 sps:$4 sm:$0xff]  }
  0xb7   : > { %1759 = vmatpush3.bf16.msra.mxu0 %v2156_v23  ;;  %2003 = vmatpush3.bf16.msra.mxu1 %v2156_v23 }
  0xb8   : > { %1760 = vmatprep.subr.bf16.mxu0 %v2157_v24  ;;  %1996 = vmatprep.subr.bf16.mxu1 %v2157_v24 }
  0xbb   : > { %1761 = vmatpush3.bf16.msra.mxu0 %v2158_v25  ;;  %2004 = vmatpush3.bf16.msra.mxu1 %v2158_v25 }
  0xbc   : > { %1762 = vmatprep.subr.bf16.mxu0 %v2159_v26  ;;  %1997 = vmatprep.subr.bf16.mxu1 %v2159_v26 }
  0xbf   : > { %1763 = vmatpush3.bf16.msra.mxu0 %v2160_v29  ;;  %2005 = vmatpush3.bf16.msra.mxu1 %v2160_v29 }
  0xc0   : > { %1764 = vmatprep.subr.bf16.mxu0 %v2161_v30  ;;  %1998 = vmatprep.subr.bf16.mxu1 %v2161_v30 }
  0xc3   : > { %1765 = vmatpush3.bf16.msra.mxu0 %v2162_v31  ;;  %2006 = vmatpush3.bf16.msra.mxu1 %v2162_v31 }
  0xc4   : > { %1766 = vmatprep.subr.bf16.mxu0 %v2163_v32  ;;  %1999 = vmatprep.subr.bf16.mxu1 %v2163_v32 }
  0xc7   : > { %1767 = vmatpush3.bf16.msra.mxu0 %v2164_v33  ;;  %2007 = vmatpush3.bf16.msra.mxu1 %v2164_v33 }
  0xca   : > { %764 = vmatmul.mubr.bf16.vlgmr.msra.gmra.mrb[0].mxu0 %v2165_v34  ;;  %796 = vmatmul.mubr.bf16.vlgmr.msra.gmra.mrb[0].mxu1 %v2168_v35 }
  0xcb   : > { %771 = vmatprep.mubr.bf16.mxu0 %v2171_v36  ;;  %803 = vmatprep.mubr.bf16.mxu1 %v2173_v37 }
  0xd2   : > { %772 = vmatmul.mubr.bf16.gmra.mrb[4].mxu0 %v2175_v38  ;;  %804 = vmatmul.mubr.bf16.gmra.mrb[4].mxu1 %v2176_v39 }
  0xd3   : > { %779 = vmatprep.mubr.bf16.mxu0 %v2177_v40  ;;  %811 = vmatprep.mubr.bf16.mxu1 %v2179_v41 }
  0xda   : > { %780 = vmatmul.mubr.bf16.gmra.mrb[8].mxu0 %v2181_v42  ;;  %812 = vmatmul.mubr.bf16.gmra.mrb[8].mxu1 %v2182_v43 }
  0xdb   : > { %787 = vmatprep.mubr.bf16.mxu0 %v2183_v44  ;;  %819 = vmatprep.mubr.bf16.mxu1 %v2185_v45 }
  0xe2   : > { %788 = vmatmul.mubr.bf16.gmra.mrb[12].mxu0 %v2187_v46  ;;  %820 = vmatmul.mubr.bf16.gmra.mrb[12].mxu1 %v2188_v47 }
 0x19d   : > { %v1768_v48 = vpop.f32.mrb[0].mxu0  ;;  %v1792_v49 = vpop.f32.mrb[0].mxu1 }
 0x19e   : > { %v1769_v50 = vpop.f32.mrb[1].mxu0  ;;  %v1793_v51 = vpop.f32.mrb[1].mxu1 }
 0x19f   : > { %v1770_v52 = vadd.f32 %v1769_v50, %v1768_v48  ;;  %v1794_v53 = vadd.f32 %v1793_v51, %v1792_v49  ;;  %v1771_v54 = vpop.f32.mrb[2].mxu0  ;;  %v1795_v55 = vpop.f32.mrb[2].mxu1 }
 0x1a0   : > { %v1772_v56 = vpop.f32.mrb[3].mxu0  ;;  %v1796_v57 = vpop.f32.mrb[3].mxu1 }
 0x1a1   : > { %v1773_v58 = vadd.f32 %v1772_v56, %v1771_v54  ;;  %v1797_v59 = vadd.f32 %v1796_v57, %v1795_v55 }
 0x1a3   : > { %v828_v60 = vpack.c.bf16 %v1773_v58, %v1770_v52  ;;  %v832_v61 = vpack.c.bf16 %v1797_v59, %v1794_v53 }
 0x1a5   : > { %838 = vst [vmem:[%s2798_s0] sm:$0xff] %v828_v60  ;;  %842 = vst [vmem:[%s2798_s0 + $0x20] sm:$0xff] %v832_v61  ;;  %v1774_v62 = vpop.f32.mrb[4].mxu0  ;;  %v1798_v63 = vpop.f32.mrb[4].mxu1 }
 0x1a6   : > { %v1775_v0 = vpop.f32.mrb[5].mxu0  ;;  %v1799_v1 = vpop.f32.mrb[5].mxu1 }
 0x1a7   : > { %v1776_v2 = vadd.f32 %v1775_v0, %v1774_v62  ;;  %v1800_v3 = vadd.f32 %v1799_v1, %v1798_v63  ;;  %v1777_v4 = vpop.f32.mrb[6].mxu0  ;;  %v1801_v5 = vpop.f32.mrb[6].mxu1 }
 0x1a8   : > { %v1778_v6 = vpop.f32.mrb[7].mxu0  ;;  %v1802_v7 = vpop.f32.mrb[7].mxu1 }
 0x1a9   : > { %v1779_v8 = vadd.f32 %v1778_v6, %v1777_v4  ;;  %v1803_v9 = vadd.f32 %v1802_v7, %v1801_v5 }
 0x1ab   : > { %v829_v10 = vpack.c.bf16 %v1779_v8, %v1776_v2  ;;  %v833_v11 = vpack.c.bf16 %v1803_v9, %v1800_v3 }
 0x1ad   : > { %839 = vst [vmem:[%s2798_s0 + $0x8] sm:$0xff] %v829_v10  ;;  %843 = vst [vmem:[%s2798_s0 + $0x28] sm:$0xff] %v833_v11  ;;  %v1780_v12 = vpop.f32.mrb[8].mxu0  ;;  %v1804_v13 = vpop.f32.mrb[8].mxu1 }
 0x1ae   : > { %v1781_v14 = vpop.f32.mrb[9].mxu0  ;;  %v1805_v15 = vpop.f32.mrb[9].mxu1 }
 0x1af   : > { %v1782_v16 = vadd.f32 %v1781_v14, %v1780_v12  ;;  %v1806_v17 = vadd.f32 %v1805_v15, %v1804_v13  ;;  %v1783_v18 = vpop.f32.mrb[10].mxu0  ;;  %v1807_v19 = vpop.f32.mrb[10].mxu1 }
 0x1b0   : > { %v1784_v20 = vpop.f32.mrb[11].mxu0  ;;  %v1808_v21 = vpop.f32.mrb[11].mxu1 }
 0x1b1   : > { %v1785_v22 = vadd.f32 %v1784_v20, %v1783_v18  ;;  %v1809_v23 = vadd.f32 %v1808_v21, %v1807_v19 }
 0x1b3   : > { %v830_v24 = vpack.c.bf16 %v1785_v22, %v1782_v16  ;;  %v834_v25 = vpack.c.bf16 %v1809_v23, %v1806_v17 }
 0x1b5   : > { %840 = vst [vmem:[%s2798_s0 + $0x10] sm:$0xff] %v830_v24  ;;  %844 = vst [vmem:[%s2798_s0 + $0x30] sm:$0xff] %v834_v25  ;;  %v1786_v26 = vpop.f32.mrb[12].mxu0  ;;  %v1810_v27 = vpop.f32.mrb[12].mxu1 }
 0x1b6   : > { %v1787_v28 = vpop.f32.mrb[13].mxu0  ;;  %v1811_v29 = vpop.f32.mrb[13].mxu1 }
 0x1b7   : > { %v1788_v30 = vadd.f32 %v1787_v28, %v1786_v26  ;;  %v1812_v31 = vadd.f32 %v1811_v29, %v1810_v27  ;;  %v1789_v32 = vpop.f32.mrb[14].mxu0  ;;  %v1813_v33 = vpop.f32.mrb[14].mxu1 }
 0x1b8   : > { %v1790_v34 = vpop.f32.mrb[15].mxu0  ;;  %v1814_v35 = vpop.f32.mrb[15].mxu1 }
 0x1b9   : > { %v1791_v36 = vadd.f32 %v1790_v34, %v1789_v32  ;;  %v1815_v37 = vadd.f32 %v1814_v35, %v1813_v33 }
 0x1bb   : > { %v831_v38 = vpack.c.bf16 %v1791_v36, %v1788_v30  ;;  %v835_v39 = vpack.c.bf16 %v1815_v37, %v1812_v31 }
 0x1bd   : > { %841 = vst [vmem:[%s2798_s0 + $0x18] sm:$0xff] %v831_v38  ;;  %845 = vst [vmem:[%s2798_s0 + $0x38] sm:$0xff] %v835_v39 }
 0x1be PF: > { %p1726_p0 = scmp.ne.s32.totalorder %s2443_s25, 1 }
 0x1bf   : > { %s2810_s9 = scalar_lea.vmem (!%p1726_p0), [#allocation2], %s2755_s8  ;;  %v2189_v50 = vld [vmem:[#allocation10] sm:$0xff] (!%p1726_p0)   ;;  %v2190_v51 = vld [vmem:[#allocation10 + $0x8] sm:$0xff] (!%p1726_p0)   ;;  %v2191_v53 = vld [vmem:[#allocation10 + $0x10] sm:$0xff] (!%p1726_p0)   ;;  %s850_s27 = sshra.s32 (!%p1726_p0), %s2755_s8, 4 }
 0x1c0   : > { %849 = sbr.rel (%p1726_p0) target bundleno = 982 (0x3d6), region = 68  ;;  %1960 = vmatprep.subr.bf16.mxu1 (!%p1726_p0), %v2189_v50  ;;  %v2192_v11 = vld [vmem:[#allocation10 + $0x18] sm:$0xff] (!%p1726_p0)   ;;  %v2193_v12 = vld [vmem:[#allocation10 + $0x20] sm:$0xff] (!%p1726_p0)   ;;  %v2194_v13 = vld [vmem:[#allocation10 + $0x28] sm:$0xff] (!%p1726_p0)   ;;  %s1738_s18 = sshll.u32 (!%p1726_p0), %s850_s27, 3 }
 0x1c1   : > { %1961 = vmatpush3.bf16.msra.mxu1 (!%p1726_p0), %v2189_v50  ;;  %v2195_v14 = vld [vmem:[#allocation10 + $0x30] sm:$0xff] (!%p1726_p0)   ;;  %v2196_v15 = vld [vmem:[#allocation10 + $0x38] sm:$0xff] (!%p1726_p0)   ;;  %v2831_v18 = vld [vmem:[%s3058_s3] ss:$0 sm:$0xff] (!%p1726_p0)  ;;  %s1185_s17 = scalar_lea.vmem (!%p1726_p0), [#allocation4], %s1738_s18 }
 0x1c2   : > { %1962 = vmatprep.subr.bf16.mxu1 (!%p1726_p0), %v2190_v51 }
 0x1c4   : > { %v879_v40 = vld [vmem:[#allocation3 + $0x40] sm:$0xff] (!%p1726_p0)  ;;  %v880_v42 = vld [vmem:[#allocation3 + $0x48] sm:$0xff] (!%p1726_p0)  ;;  %v881_v44 = vld [vmem:[#allocation3 + $0x50] sm:$0xff] (!%p1726_p0) }
 0x1c5   : > { %v871_v41 = vld [vmem:[#allocation3] sm:$0xff] (!%p1726_p0)  ;;  %1816 = vmatprep.subr.bf16.mxu0 (!%p1726_p0), %v879_v40  ;;  %v872_v43 = vld [vmem:[#allocation3 + $0x8] sm:$0xff] (!%p1726_p0)  ;;  %v873_v46 = vld [vmem:[#allocation3 + $0x10] sm:$0xff] (!%p1726_p0)  ;;  %1963 = vmatpush3.bf16.msra.mxu1 (!%p1726_p0), %v2190_v51 }
 0x1c6   : > { %1817 = vmatpush3.bf16.msra.mxu0 (!%p1726_p0), %v871_v41  ;;  %v856_v45 = vld [vmem:[%s2810_s9 + $0x8] sm:$0xff] (!%p1726_p0)  ;;  %v882_v47 = vld [vmem:[#allocation3 + $0x58] sm:$0xff] (!%p1726_p0)  ;;  %v883_v49 = vld [vmem:[#allocation3 + $0x60] sm:$0xff] (!%p1726_p0)  ;;  %1964 = vmatprep.subr.bf16.mxu1 (!%p1726_p0), %v2191_v53 }
 0x1c7   : > { %1818 = vmatprep.subr.bf16.mxu0 %v880_v42  ;;  %926 = vmatprep.mubr.bf16.mxu0 %v856_v45  ;;  %v874_v48 = vld [vmem:[#allocation3 + $0x18] sm:$0xff]  ;;  %v875_v52 = vld [vmem:[#allocation3 + $0x20] sm:$0xff]  ;;  %v884_v54 = vld [vmem:[#allocation3 + $0x68] sm:$0xff] }
 0x1c8   : > { %v876_v55 = vld [vmem:[#allocation3 + $0x28] sm:$0xff]  ;;  %v885_v56 = vld [vmem:[#allocation3 + $0x70] sm:$0xff]  ;;  %v886_v58 = vld [vmem:[#allocation3 + $0x78] sm:$0xff] }
 0x1c9   : > { %1965 = vmatpush3.bf16.msra.mxu1 %v2191_v53  ;;  %v877_v57 = vld [vmem:[#allocation3 + $0x30] sm:$0xff]  ;;  %v878_v59 = vld [vmem:[#allocation3 + $0x38] sm:$0xff]  ;;  %v855_v60 = vld [vmem:[%s2810_s9] sm:$0xff] }
 0x1ca   : > { %1819 = vmatpush3.bf16.msra.mxu0 %v872_v43  ;;  %v858_v61 = vld [vmem:[%s2810_s9 + $0x18] sm:$0xff]  ;;  %v857_v62 = vld [vmem:[%s2810_s9 + $0x10] sm:$0xff]  ;;  %v860_v63 = vld [vmem:[%s2810_s9 + $0x28] sm:$0xff]  ;;  %1966 = vmatprep.subr.bf16.mxu1 %v2192_v11 }
 0x1cb   : > { %1820 = vmatprep.subr.bf16.mxu0 %v881_v44  ;;  %v859_v0 = vld [vmem:[%s2810_s9 + $0x20] sm:$0xff]  ;;  %v862_v1 = vld [vmem:[%s2810_s9 + $0x38] sm:$0xff]  ;;  %v861_v2 = vld [vmem:[%s2810_s9 + $0x30] sm:$0xff] }
 0x1cc   : > { %v864_v3 = vld [vmem:[%s2810_s9 + $0x48] sm:$0xff]  ;;  %v863_v4 = vld [vmem:[%s2810_s9 + $0x40] sm:$0xff]  ;;  %v866_v5 = vld [vmem:[%s2810_s9 + $0x58] sm:$0xff] }
 0x1cd   : > { %v865_v6 = vld [vmem:[%s2810_s9 + $0x50] sm:$0xff]  ;;  %v868_v7 = vld [vmem:[%s2810_s9 + $0x68] sm:$0xff]  ;;  %v867_v8 = vld [vmem:[%s2810_s9 + $0x60] sm:$0xff]  ;;  %1967 = vmatpush3.bf16.msra.mxu1 %v2192_v11 }
 0x1ce   : > { %1821 = vmatpush3.bf16.msra.mxu0 %v873_v46  ;;  %v870_v9 = vld [vmem:[%s2810_s9 + $0x78] sm:$0xff]  ;;  %v869_v10 = vld [vmem:[%s2810_s9 + $0x70] sm:$0xff]  ;;  %1968 = vmatprep.subr.bf16.mxu1 %v2193_v12 }
 0x1cf   : > { %1822 = vmatprep.subr.bf16.mxu0 %v882_v47 }
 0x1d1   : > { %1969 = vmatpush3.bf16.msra.mxu1 %v2193_v12 }
 0x1d2   : > { %1823 = vmatpush3.bf16.msra.mxu0 %v874_v48  ;;  %1970 = vmatprep.subr.bf16.mxu1 %v2194_v13 }
 0x1d3   : > { %1824 = vmatprep.subr.bf16.mxu0 %v883_v49 }
 0x1d5   : > { %1971 = vmatpush3.bf16.msra.mxu1 %v2194_v13 }
 0x1d6   : > { %1825 = vmatpush3.bf16.msra.mxu0 %v875_v52  ;;  %1972 = vmatprep.subr.bf16.mxu1 %v2195_v14 }
 0x1d7   : > { %1826 = vmatprep.subr.bf16.mxu0 %v884_v54 }
 0x1d9   : > { %1973 = vmatpush3.bf16.msra.mxu1 %v2195_v14 }
 0x1da   : > { %1827 = vmatpush3.bf16.msra.mxu0 %v876_v55  ;;  %1974 = vmatprep.subr.bf16.mxu1 %v2196_v15 }
 0x1db   : > { %1828 = vmatprep.subr.bf16.mxu0 %v885_v56 }
 0x1dd   : > { %1975 = vmatpush3.bf16.msra.mxu1 %v2196_v15 }
 0x1de   : > { %1829 = vmatpush3.bf16.msra.mxu0 %v877_v57 }
 0x1df   : > { %1830 = vmatprep.subr.bf16.mxu0 %v886_v58 }
 0x1e2   : > { %1831 = vmatpush3.bf16.msra.mxu0 %v878_v59 }
 0x1e5   : > { %927 = vmatmul.mubr.bf16.vlgmr.msra.gmra.mrb[0].mxu0 %v855_v60 }
 0x1e6   : > { %934 = vmatprep.mubr.bf16.mxu0 %v858_v61 }
 0x1ed   : > { %935 = vmatmul.mubr.bf16.gmra.mrb[4].mxu0 %v857_v62 }
 0x1ee   : > { %942 = vmatprep.mubr.bf16.mxu0 %v860_v63 }
 0x1f5   : > { %943 = vmatmul.mubr.bf16.gmra.mrb[8].mxu0 %v859_v0 }
 0x1f6   : > { %950 = vmatprep.mubr.bf16.mxu0 %v862_v1 }
 0x1fd   : > { %951 = vmatmul.mubr.bf16.gmra.mrb[12].mxu0 %v861_v2 }
 0x1fe   : > { %958 = vmatprep.mubr.bf16.mxu0 %v864_v3 }
 0x205   : > { %959 = vmatmul.mubr.bf16.gmra.mrb[16].mxu0 %v863_v4 }
 0x206   : > { %966 = vmatprep.mubr.bf16.mxu0 %v866_v5 }
 0x20d   : > { %967 = vmatmul.mubr.bf16.gmra.mrb[20].mxu0 %v865_v6 }
 0x20e   : > { %974 = vmatprep.mubr.bf16.mxu0 %v868_v7 }
 0x215   : > { %975 = vmatmul.mubr.bf16.gmra.mrb[24].mxu0 %v867_v8 }
 0x216   : > { %982 = vmatprep.mubr.bf16.mxu0 %v870_v9 }
 0x21d   : > { %983 = vmatmul.mubr.bf16.gmra.mrb[28].mxu0 %v869_v10 }
 0x2b8   : > { %v1832_v16 = vpop.f32.mrb[0].mxu0 }
 0x2b9   : > { %v1833_v17 = vpop.f32.mrb[1].mxu0 }
 0x2ba   : > { %v1834_v19 = vadd.f32 %v1833_v17, %v1832_v16  ;;  %v1835_v20 = vpop.f32.mrb[2].mxu0 }
 0x2bb   : > { %v1836_v21 = vpop.f32.mrb[3].mxu0 }
 0x2bc   : > { %v1837_v22 = vadd.f32 %v1836_v21, %v1835_v20  ;;  %v929_v23 = vadd.f32 %v1834_v19, %v2831_v18 }
 0x2be   : > { %v932_v24 = vadd.f32 %v1837_v22, %v2831_v18  ;;  %v991_v26 = vmax.f32 %v929_v23, 0.0 }
 0x2c0   : > { %v1838_v25 = vpop.f32.mrb[4].mxu0  ;;  %v992_v27 = vmax.f32 %v932_v24, 0.0 }
 0x2c1   : > { %v1839_v28 = vpop.f32.mrb[5].mxu0 }
 0x2c2   : > { %v1840_v29 = vadd.f32 %v1839_v28, %v1838_v25  ;;  %v1841_v30 = vpop.f32.mrb[6].mxu0  ;;  %v1007_v31 = vpack.c.bf16 %v992_v27, %v991_v26 }
 0x2c3   : > { %v1842_v32 = vpop.f32.mrb[7].mxu0 }
 0x2c4   : > { %v937_v33 = vadd.f32 %v1840_v29, %v2831_v18  ;;  %v1843_v34 = vadd.f32 %v1842_v32, %v1841_v30  ;;  %1976 = vmatprep.mubr.bf16.mxu1 %v1007_v31 }
 0x2c6   : > { %v940_v35 = vadd.f32 %v1843_v34, %v2831_v18  ;;  %v993_v36 = vmax.f32 %v937_v33, 0.0 }
 0x2c8   : > { %v994_v37 = vmax.f32 %v940_v35, 0.0  ;;  %v1844_v38 = vpop.f32.mrb[8].mxu0 }
 0x2c9   : > { %v1845_v39 = vpop.f32.mrb[9].mxu0 }
 0x2ca   : > { %v1846_v40 = vadd.f32 %v1845_v39, %v1844_v38  ;;  %v1847_v41 = vpop.f32.mrb[10].mxu0  ;;  %v1008_v42 = vpack.c.bf16 %v994_v37, %v993_v36 }
 0x2cb   : > { %v1848_v43 = vpop.f32.mrb[11].mxu0 }
 0x2cc   : > { %v945_v44 = vadd.f32 %v1846_v40, %v2831_v18  ;;  %v1849_v45 = vadd.f32 %v1848_v43, %v1847_v41  ;;  %1977 = vmatmul.mubr.bf16.vlgmr.msra.gmra.mrb[0].mxu1 %v1008_v42 }
 0x2ce   : > { %v948_v46 = vadd.f32 %v1849_v45, %v2831_v18  ;;  %v995_v47 = vmax.f32 %v945_v44, 0.0 }
 0x2d0   : > { %v996_v48 = vmax.f32 %v948_v46, 0.0  ;;  %v1850_v49 = vpop.f32.mrb[12].mxu0 }
 0x2d1   : > { %v1851_v50 = vpop.f32.mrb[13].mxu0 }
 0x2d2   : > { %v1852_v51 = vadd.f32 %v1851_v50, %v1850_v49  ;;  %v1853_v52 = vpop.f32.mrb[14].mxu0  ;;  %v1009_v53 = vpack.c.bf16 %v996_v48, %v995_v47 }
 0x2d3   : > { %v1854_v54 = vpop.f32.mrb[15].mxu0 }
 0x2d4   : > { %v953_v55 = vadd.f32 %v1852_v51, %v2831_v18  ;;  %v1855_v56 = vadd.f32 %v1854_v54, %v1853_v52  ;;  %1980 = vmatprep.mubr.bf16.mxu1 %v1009_v53 }
 0x2d6   : > { %v956_v57 = vadd.f32 %v1855_v56, %v2831_v18  ;;  %v997_v58 = vmax.f32 %v953_v55, 0.0 }
 0x2d8   : > { %v998_v59 = vmax.f32 %v956_v57, 0.0  ;;  %v1856_v60 = vpop.f32.mrb[16].mxu0 }
 0x2d9   : > { %v1857_v61 = vpop.f32.mrb[17].mxu0 }
 0x2da   : > { %v1858_v62 = vadd.f32 %v1857_v61, %v1856_v60  ;;  %v1859_v63 = vpop.f32.mrb[18].mxu0  ;;  %v1010_v0 = vpack.c.bf16 %v998_v59, %v997_v58 }
 0x2db   : > { %v1860_v1 = vpop.f32.mrb[19].mxu0 }
 0x2dc   : > { %v961_v2 = vadd.f32 %v1858_v62, %v2831_v18  ;;  %v1861_v3 = vadd.f32 %v1860_v1, %v1859_v63  ;;  %1981 = vmatmul.mubr.bf16.gmra.mrb[4].mxu1 %v1010_v0 }
 0x2de   : > { %v964_v4 = vadd.f32 %v1861_v3, %v2831_v18  ;;  %v999_v5 = vmax.f32 %v961_v2, 0.0 }
 0x2e0   : > { %v1000_v6 = vmax.f32 %v964_v4, 0.0  ;;  %v1862_v7 = vpop.f32.mrb[20].mxu0 }
 0x2e1   : > { %v1863_v8 = vpop.f32.mrb[21].mxu0 }
 0x2e2   : > { %v1864_v9 = vadd.f32 %v1863_v8, %v1862_v7  ;;  %v1865_v10 = vpop.f32.mrb[22].mxu0  ;;  %v1011_v11 = vpack.c.bf16 %v1000_v6, %v999_v5 }
 0x2e3   : > { %v1866_v12 = vpop.f32.mrb[23].mxu0 }
 0x2e4   : > { %v969_v13 = vadd.f32 %v1864_v9, %v2831_v18  ;;  %v1867_v14 = vadd.f32 %v1866_v12, %v1865_v10  ;;  %1984 = vmatprep.mubr.bf16.mxu1 %v1011_v11 }
 0x2e6   : > { %v972_v15 = vadd.f32 %v1867_v14, %v2831_v18  ;;  %v1001_v16 = vmax.f32 %v969_v13, 0.0 }
 0x2e8   : > { %v1002_v17 = vmax.f32 %v972_v15, 0.0  ;;  %v1868_v19 = vpop.f32.mrb[24].mxu0 }
 0x2e9   : > { %v1869_v20 = vpop.f32.mrb[25].mxu0 }
 0x2ea   : > { %v1870_v21 = vadd.f32 %v1869_v20, %v1868_v19  ;;  %v1871_v22 = vpop.f32.mrb[26].mxu0  ;;  %v1012_v23 = vpack.c.bf16 %v1002_v17, %v1001_v16 }
 0x2eb   : > { %v1872_v24 = vpop.f32.mrb[27].mxu0 }
 0x2ec   : > { %v977_v25 = vadd.f32 %v1870_v21, %v2831_v18  ;;  %v1873_v26 = vadd.f32 %v1872_v24, %v1871_v22  ;;  %1985 = vmatmul.mubr.bf16.gmra.mrb[8].mxu1 %v1012_v23 }
 0x2ee   : > { %v980_v27 = vadd.f32 %v1873_v26, %v2831_v18  ;;  %v1003_v28 = vmax.f32 %v977_v25, 0.0 }
 0x2f0   : > { %v1004_v29 = vmax.f32 %v980_v27, 0.0  ;;  %v1874_v30 = vpop.f32.mrb[28].mxu0 }
 0x2f1   : > { %v1875_v31 = vpop.f32.mrb[29].mxu0 }
 0x2f2   : > { %v1876_v32 = vadd.f32 %v1875_v31, %v1874_v30  ;;  %v1877_v33 = vpop.f32.mrb[30].mxu0  ;;  %v1013_v34 = vpack.c.bf16 %v1004_v29, %v1003_v28 }
 0x2f3   : > { %v1878_v35 = vpop.f32.mrb[31].mxu0 }
 0x2f4   : > { %v985_v36 = vadd.f32 %v1876_v32, %v2831_v18  ;;  %v1879_v37 = vadd.f32 %v1878_v35, %v1877_v33  ;;  %1988 = vmatprep.mubr.bf16.mxu1 %v1013_v34 }
 0x2f6   : > { %v988_v38 = vadd.f32 %v1879_v37, %v2831_v18  ;;  %v1005_v39 = vmax.f32 %v985_v36, 0.0 }
 0x2f8   : > { %v1006_v40 = vmax.f32 %v988_v38, 0.0 }
 0x2fa   : > { %v1014_v41 = vpack.c.bf16 %v1006_v40, %v1005_v39 }
 0x2fc   : > { %1989 = vmatmul.mubr.bf16.gmra.mrb[12].mxu1 %v1014_v41 }
 0x39f   : > { %v1978_v42 = vpop.f32.mrb[0].mxu1 }
 0x3a0   : > { %v1113_v43 = vpop.f32.mrb[1].mxu1 }
 0x3a1   : > { %v1979_v44 = vpop.f32.mrb[2].mxu1 }
 0x3a2   : > { %v1177_v45 = vpack.c.bf16 %v1979_v44, %v1978_v42  ;;  %v1116_v46 = vpop.f32.mrb[3].mxu1 }
 0x3a3   : > { %v1176_v47 = vpack.c.bf16 %v1116_v46, %v1113_v43 }
 0x3a4   : > { %1187 = vst [vmem:[%s1185_s17 + $0x8] sm:$0xff] %v1177_v45 }
 0x3a5   : > { %1186 = vst [vmem:[%s1185_s17] sm:$0xff] %v1176_v47 }
 0x3af   : > { %v1982_v48 = vpop.f32.mrb[4].mxu1 }
 0x3b0   : > { %v1129_v49 = vpop.f32.mrb[5].mxu1 }
 0x3b1   : > { %v1983_v50 = vpop.f32.mrb[6].mxu1 }
 0x3b2   : > { %v1179_v51 = vpack.c.bf16 %v1983_v50, %v1982_v48  ;;  %v1132_v18 = vpop.f32.mrb[7].mxu1 }
 0x3b3   : > { %v1178_v52 = vpack.c.bf16 %v1132_v18, %v1129_v49 }
 0x3b4   : > { %1189 = vst [vmem:[%s1185_s17 + $0x18] sm:$0xff] %v1179_v51 }
 0x3b5   : > { %1188 = vst [vmem:[%s1185_s17 + $0x10] sm:$0xff] %v1178_v52 }
 0x3bf   : > { %v1986_v53 = vpop.f32.mrb[8].mxu1 }
 0x3c0   : > { %v1145_v54 = vpop.f32.mrb[9].mxu1 }
 0x3c1   : > { %v1987_v55 = vpop.f32.mrb[10].mxu1 }
 0x3c2   : > { %v1181_v56 = vpack.c.bf16 %v1987_v55, %v1986_v53  ;;  %v1148_v57 = vpop.f32.mrb[11].mxu1 }
 0x3c3   : > { %v1180_v58 = vpack.c.bf16 %v1148_v57, %v1145_v54 }
 0x3c4   : > { %1191 = vst [vmem:[%s1185_s17 + $0x28] sm:$0xff] %v1181_v56 }
 0x3c5   : > { %1190 = vst [vmem:[%s1185_s17 + $0x20] sm:$0xff] %v1180_v58 }
 0x3cf   : > { %v1990_v59 = vpop.f32.mrb[12].mxu1 }
 0x3d0   : > { %v1161_v60 = vpop.f32.mrb[13].mxu1 }
 0x3d1   : > { %v1991_v61 = vpop.f32.mrb[14].mxu1 }
 0x3d2   : > { %v1183_v62 = vpack.c.bf16 %v1991_v61, %v1990_v59  ;;  %v1164_v63 = vpop.f32.mrb[15].mxu1 }
 0x3d3   : > { %v1182_v0 = vpack.c.bf16 %v1164_v63, %v1161_v60 }
 0x3d4   : > { %1193 = vst [vmem:[%s1185_s17 + $0x38] sm:$0xff] %v1183_v62 }
 0x3d5   : > { %1192 = vst [vmem:[%s1185_s17 + $0x30] sm:$0xff] %v1182_v0 }
 0x3d6 PF: > { %p1739_p3 = scmp.ne.s32.totalorder %s2443_s25, 2 }
 0x3d7   : > { %s2852_s21 = scalar_lea.vmem (!%p1739_p3), [#allocation2], %s2755_s8  ;;  %v2873_v38 = vld [vmem:[%s3060_s5] ss:$0 sm:$0xff] (!%p1739_p3) }
 0x3d8   : > { %1197 = sbr.rel (%p1739_p3) target bundleno = 1590 (0x636), region = 72  ;;  %v1204_v6 = vld [vmem:[%s2852_s21 + $0x8] sm:$0xff] (!%p1739_p3)  ;;  %v1203_v20 = vld [vmem:[%s2852_s21] sm:$0xff] (!%p1739_p3)  ;;  %v1206_v22 = vld [vmem:[%s2852_s21 + $0x18] sm:$0xff] (!%p1739_p3) }
 0x3d9   : > { %v1212_v7 = vld [vmem:[%s2852_s21 + $0x48] sm:$0xff] (!%p1739_p3)  ;;  %1274 = vmatprep.mubr.bf16.mxu0 (!%p1739_p3), %v1204_v6  ;;  %v1211_v21 = vld [vmem:[%s2852_s21 + $0x40] sm:$0xff] (!%p1739_p3)  ;;  %v1214_v23 = vld [vmem:[%s2852_s21 + $0x58] sm:$0xff] (!%p1739_p3) }
 0x3da   : > { %1306 = vmatprep.mubr.bf16.mxu1 (!%p1739_p3), %v1212_v7  ;;  %v1205_v24 = vld [vmem:[%s2852_s21 + $0x10] sm:$0xff] (!%p1739_p3)  ;;  %v1208_v26 = vld [vmem:[%s2852_s21 + $0x28] sm:$0xff] (!%p1739_p3)  ;;  %v1207_v28 = vld [vmem:[%s2852_s21 + $0x20] sm:$0xff] (!%p1739_p3) }
 0x3db   : > { %v1213_v25 = vld [vmem:[%s2852_s21 + $0x50] sm:$0xff] (!%p1739_p3)  ;;  %v1216_v27 = vld [vmem:[%s2852_s21 + $0x68] sm:$0xff] (!%p1739_p3)  ;;  %v1215_v29 = vld [vmem:[%s2852_s21 + $0x60] sm:$0xff] (!%p1739_p3) }
 0x3dc   : > { %v1227_v1 = vld [vmem:[#allocation4 + $0x40] sm:$0xff] (!%p1739_p3)  ;;  %v1228_v3 = vld [vmem:[#allocation4 + $0x48] sm:$0xff] (!%p1739_p3)  ;;  %v1229_v5 = vld [vmem:[#allocation4 + $0x50] sm:$0xff] (!%p1739_p3) }
 0x3dd   : > { %v1219_v2 = vld [vmem:[#allocation4] sm:$0xff] (!%p1739_p3)  ;;  %1896 = vmatprep.subr.bf16.mxu0 (!%p1739_p3), %v1227_v1  ;;  %2008 = vmatprep.subr.bf16.mxu1 (!%p1739_p3), %v1227_v1  ;;  %v1220_v4 = vld [vmem:[#allocation4 + $0x8] sm:$0xff] (!%p1739_p3)  ;;  %v1221_v8 = vld [vmem:[#allocation4 + $0x10] sm:$0xff] (!%p1739_p3) }
 0x3de   : > { %1897 = vmatpush3.bf16.msra.mxu0 (!%p1739_p3), %v1219_v2  ;;  %2016 = vmatpush3.bf16.msra.mxu1 (!%p1739_p3), %v1219_v2  ;;  %v1230_v9 = vld [vmem:[#allocation4 + $0x58] sm:$0xff] (!%p1739_p3)  ;;  %v1231_v11 = vld [vmem:[#allocation4 + $0x60] sm:$0xff] (!%p1739_p3)  ;;  %v1232_v13 = vld [vmem:[#allocation4 + $0x68] sm:$0xff] (!%p1739_p3) }
 0x3df   : > { %1898 = vmatprep.subr.bf16.mxu0 %v1228_v3  ;;  %2009 = vmatprep.subr.bf16.mxu1 %v1228_v3  ;;  %v1222_v10 = vld [vmem:[#allocation4 + $0x18] sm:$0xff]  ;;  %v1223_v12 = vld [vmem:[#allocation4 + $0x20] sm:$0xff]  ;;  %v1224_v14 = vld [vmem:[#allocation4 + $0x28] sm:$0xff] }
 0x3e0   : > { %v1233_v15 = vld [vmem:[#allocation4 + $0x70] sm:$0xff]  ;;  %v1234_v17 = vld [vmem:[#allocation4 + $0x78] sm:$0xff] }
 0x3e1   : > { %v1225_v16 = vld [vmem:[#allocation4 + $0x30] sm:$0xff]  ;;  %v1226_v19 = vld [vmem:[#allocation4 + $0x38] sm:$0xff] }
 0x3e2   : > { %1899 = vmatpush3.bf16.msra.mxu0 %v1220_v4  ;;  %2017 = vmatpush3.bf16.msra.mxu1 %v1220_v4  ;;  %v1210_v30 = vld [vmem:[%s2852_s21 + $0x38] sm:$0xff]  ;;  %v1209_v32 = vld [vmem:[%s2852_s21 + $0x30] sm:$0xff] }
 0x3e3   : > { %1900 = vmatprep.subr.bf16.mxu0 %v1229_v5  ;;  %2010 = vmatprep.subr.bf16.mxu1 %v1229_v5  ;;  %v1218_v31 = vld [vmem:[%s2852_s21 + $0x78] sm:$0xff]  ;;  %v1217_v33 = vld [vmem:[%s2852_s21 + $0x70] sm:$0xff] }
 0x3e6   : > { %1901 = vmatpush3.bf16.msra.mxu0 %v1221_v8  ;;  %2018 = vmatpush3.bf16.msra.mxu1 %v1221_v8 }
 0x3e7   : > { %1902 = vmatprep.subr.bf16.mxu0 %v1230_v9  ;;  %2011 = vmatprep.subr.bf16.mxu1 %v1230_v9 }
 0x3ea   : > { %1903 = vmatpush3.bf16.msra.mxu0 %v1222_v10  ;;  %2019 = vmatpush3.bf16.msra.mxu1 %v1222_v10 }
 0x3eb   : > { %1904 = vmatprep.subr.bf16.mxu0 %v1231_v11  ;;  %2012 = vmatprep.subr.bf16.mxu1 %v1231_v11 }
 0x3ee   : > { %1905 = vmatpush3.bf16.msra.mxu0 %v1223_v12  ;;  %2020 = vmatpush3.bf16.msra.mxu1 %v1223_v12 }
 0x3ef   : > { %1906 = vmatprep.subr.bf16.mxu0 %v1232_v13  ;;  %2013 = vmatprep.subr.bf16.mxu1 %v1232_v13 }
 0x3f2   : > { %1907 = vmatpush3.bf16.msra.mxu0 %v1224_v14  ;;  %2021 = vmatpush3.bf16.msra.mxu1 %v1224_v14 }
 0x3f3   : > { %1908 = vmatprep.subr.bf16.mxu0 %v1233_v15  ;;  %2014 = vmatprep.subr.bf16.mxu1 %v1233_v15 }
 0x3f6   : > { %1909 = vmatpush3.bf16.msra.mxu0 %v1225_v16  ;;  %2022 = vmatpush3.bf16.msra.mxu1 %v1225_v16 }
 0x3f7   : > { %1910 = vmatprep.subr.bf16.mxu0 %v1234_v17  ;;  %2015 = vmatprep.subr.bf16.mxu1 %v1234_v17 }
 0x3fa   : > { %1911 = vmatpush3.bf16.msra.mxu0 %v1226_v19  ;;  %2023 = vmatpush3.bf16.msra.mxu1 %v1226_v19 }
 0x3fd   : > { %1275 = vmatmul.mubr.bf16.vlgmr.msra.gmra.mrb[0].mxu0 %v1203_v20  ;;  %1307 = vmatmul.mubr.bf16.vlgmr.msra.gmra.mrb[0].mxu1 %v1211_v21 }
 0x3fe   : > { %1282 = vmatprep.mubr.bf16.mxu0 %v1206_v22  ;;  %1314 = vmatprep.mubr.bf16.mxu1 %v1214_v23 }
 0x405   : > { %1283 = vmatmul.mubr.bf16.gmra.mrb[4].mxu0 %v1205_v24  ;;  %1315 = vmatmul.mubr.bf16.gmra.mrb[4].mxu1 %v1213_v25 }
 0x406   : > { %1290 = vmatprep.mubr.bf16.mxu0 %v1208_v26  ;;  %1322 = vmatprep.mubr.bf16.mxu1 %v1216_v27 }
 0x40d   : > { %1291 = vmatmul.mubr.bf16.gmra.mrb[8].mxu0 %v1207_v28  ;;  %1323 = vmatmul.mubr.bf16.gmra.mrb[8].mxu1 %v1215_v29 }
 0x40e   : > { %1298 = vmatprep.mubr.bf16.mxu0 %v1210_v30  ;;  %1330 = vmatprep.mubr.bf16.mxu1 %v1218_v31 }
 0x415   : > { %1299 = vmatmul.mubr.bf16.gmra.mrb[12].mxu0 %v1209_v32  ;;  %1331 = vmatmul.mubr.bf16.gmra.mrb[12].mxu1 %v1217_v33 }
 0x4d0   : > { %v1912_v34 = vpop.f32.mrb[0].mxu0  ;;  %v1936_v35 = vpop.f32.mrb[0].mxu1 }
 0x4d1   : > { %v1913_v36 = vpop.f32.mrb[1].mxu0  ;;  %v1937_v37 = vpop.f32.mrb[1].mxu1 }
 0x4d2   : > { %v1914_v39 = vadd.f32 %v1913_v36, %v1912_v34  ;;  %v1938_v40 = vadd.f32 %v1937_v37, %v1936_v35  ;;  %v1915_v41 = vpop.f32.mrb[2].mxu0  ;;  %v1939_v42 = vpop.f32.mrb[2].mxu1 }
 0x4d3   : > { %v1916_v43 = vpop.f32.mrb[3].mxu0  ;;  %v1940_v44 = vpop.f32.mrb[3].mxu1 }
 0x4d4   : > { %v1917_v45 = vadd.f32 %v1916_v43, %v1915_v41  ;;  %v1941_v46 = vadd.f32 %v1940_v44, %v1939_v42  ;;  %v2876_v47 = vadd.f32 %v1914_v39, %v2873_v38  ;;  %v2883_v49 = vadd.f32 %v1938_v40, %v2873_v38 }
 0x4d6   : > { %1339 = vmax.xlane.f32.xlu0 %v2876_v47  ;;  %v2880_v48 = vadd.f32 %v1941_v46, %v2873_v38  ;;  %v2891_v61 = vadd.f32 %v1917_v45, %v2873_v38 }
 0x4d8   : > { %1357 = vmax.xlane.f32.xlu1 %v2880_v48  ;;  %v1918_v50 = vpop.f32.mrb[4].mxu0  ;;  %v1942_v51 = vpop.f32.mrb[4].mxu1 }
 0x4d9   : > { %v1919_v18 = vpop.f32.mrb[5].mxu0  ;;  %v1943_v52 = vpop.f32.mrb[5].mxu1 }
 0x4da   : > { %v1920_v53 = vadd.f32 %v1919_v18, %v1918_v50  ;;  %1355 = vmax.xlane.f32.xlu0 %v2883_v49  ;;  %v1921_v54 = vpop.f32.mrb[6].mxu0  ;;  %v1944_v55 = vadd.f32 %v1943_v52, %v1942_v51  ;;  %v1945_v56 = vpop.f32.mrb[6].mxu1 }
 0x4db   : > { %v1922_v57 = vpop.f32.mrb[7].mxu0  ;;  %v1946_v58 = vpop.f32.mrb[7].mxu1 }
 0x4dc   : > { %v1923_v59 = vadd.f32 %v1922_v57, %v1921_v54  ;;  %v2888_v60 = vadd.f32 %v1920_v53, %v2873_v38  ;;  %v1947_v62 = vadd.f32 %v1946_v58, %v1945_v56  ;;  %v2899_v0 = vadd.f32 %v1944_v55, %v2873_v38 }
 0x4de   : > { %1343 = vmax.xlane.f32.xlu1 %v2888_v60  ;;  %1341 = vmax.xlane.f32.xlu0 %v2891_v61  ;;  %v2896_v63 = vadd.f32 %v1923_v59, %v2873_v38  ;;  %v2904_v8 = vadd.f32 %v1947_v62, %v2873_v38 }
 0x4e0   : > { %v1924_v1 = vpop.f32.mrb[8].mxu0  ;;  %v1948_v2 = vpop.f32.mrb[8].mxu1 }
 0x4e1   : > { %v1925_v3 = vpop.f32.mrb[9].mxu0  ;;  %v1949_v4 = vpop.f32.mrb[9].mxu1 }
 0x4e2   : > { %v1926_v5 = vadd.f32 %v1925_v3, %v1924_v1  ;;  %1345 = vmax.xlane.f32.xlu1 %v2896_v63  ;;  %1359 = vmax.xlane.f32.xlu0 %v2899_v0  ;;  %v1927_v6 = vpop.f32.mrb[10].mxu0  ;;  %v1950_v7 = vadd.f32 %v1949_v4, %v1948_v2  ;;  %v1951_v9 = vpop.f32.mrb[10].mxu1 }
 0x4e3   : > { %v1928_v10 = vpop.f32.mrb[11].mxu0  ;;  %v1952_v11 = vpop.f32.mrb[11].mxu1 }
 0x4e4   : > { %v1929_v12 = vadd.f32 %v1928_v10, %v1927_v6  ;;  %v1293_v13 = vadd.f32 %v1926_v5, %v2873_v38  ;;  %v1953_v14 = vadd.f32 %v1952_v11, %v1951_v9  ;;  %v2912_v16 = vadd.f32 %v1950_v7, %v2873_v38 }
 0x4e6   : > { %1361 = vmax.xlane.f32.xlu1 %v2904_v8  ;;  %1347 = vmax.xlane.f32.xlu0 %v1293_v13  ;;  %v2909_v15 = vadd.f32 %v1929_v12, %v2873_v38  ;;  %v2917_v25 = vadd.f32 %v1953_v14, %v2873_v38 }
 0x4e8   : > { %v1930_v17 = vpop.f32.mrb[12].mxu0  ;;  %v1954_v19 = vpop.f32.mrb[12].mxu1 }
 0x4e9   : > { %v1931_v20 = vpop.f32.mrb[13].mxu0  ;;  %v1955_v21 = vpop.f32.mrb[13].mxu1 }
 0x4ea   : > { %v1932_v22 = vadd.f32 %v1931_v20, %v1930_v17  ;;  %1349 = vmax.xlane.f32.xlu1 %v2909_v15  ;;  %1363 = vmax.xlane.f32.xlu0 %v2912_v16  ;;  %v1933_v23 = vpop.f32.mrb[14].mxu0  ;;  %v1956_v24 = vadd.f32 %v1955_v21, %v1954_v19  ;;  %v1957_v26 = vpop.f32.mrb[14].mxu1 }
 0x4eb   : > { %v1934_v27 = vpop.f32.mrb[15].mxu0  ;;  %v1958_v28 = vpop.f32.mrb[15].mxu1 }
 0x4ec   : > { %v1935_v29 = vadd.f32 %v1934_v27, %v1933_v23  ;;  %v2920_v30 = vadd.f32 %v1932_v22, %v2873_v38  ;;  %v1959_v31 = vadd.f32 %v1958_v28, %v1957_v26  ;;  %v2928_v33 = vadd.f32 %v1956_v24, %v2873_v38 }
 0x4ee   : > { %1365 = vmax.xlane.f32.xlu1 %v2917_v25  ;;  %1351 = vmax.xlane.f32.xlu0 %v2920_v30  ;;  %v2925_v32 = vadd.f32 %v1935_v29, %v2873_v38  ;;  %v2933_v34 = vadd.f32 %v1959_v31, %v2873_v38 }
 0x4f2   : > { %1353 = vmax.xlane.f32.xlu1 %v2925_v32  ;;  %1367 = vmax.xlane.f32.xlu0 %v2928_v33 }
 0x4f6   : > { %1369 = vmax.xlane.f32.xlu1 %v2933_v34 }
 0x563   : > { %v1340_v35 = vpop.xlane.xlu0 %1339 }
 0x564   : > { %v2937_v36 = vsub.f32 %v2876_v47, %v1340_v35 }
 0x565   : > { %v1358_v39 = vpop.xlane.xlu1 %1357 }
 0x566   : > { %v1387_v37 = vmul.f32 1.442695, %v2937_v36  ;;  %v2945_v38 = vsub.f32 %v2880_v48, %v1358_v39 }
 0x567   : > { %v1356_v40 = vpop.xlane.xlu0 %1355 }
 0x568   : > { %2197 = vpow2.f32 %v1387_v37  ;;  %v2941_v41 = vsub.f32 %v2883_v49, %v1356_v40  ;;  %v1405_v18 = vmul.f32 1.442695, %v2945_v38 }
 0x56a   : > { %v1403_v42 = vmul.f32 1.442695, %v2941_v41 }
 0x56b   : > { %v1344_v43 = vpop.xlane.xlu1 %1343  ;;  %v1342_v44 = vpop.xlane.xlu0 %1341 }
 0x56c   : > { %2199 = vpow2.f32 %v1403_v42  ;;  %v2948_v45 = vsub.f32 %v2888_v60, %v1344_v43  ;;  %v2951_v46 = vsub.f32 %v2891_v61, %v1342_v44 }
 0x56e   : > { %v1391_v47 = vmul.f32 1.442695, %v2948_v45  ;;  %v1389_v50 = vmul.f32 1.442695, %v2951_v46 }
 0x56f   : > { %v1346_v49 = vpop.xlane.xlu1 %1345  ;;  %v1360_v51 = vpop.xlane.xlu0 %1359 }
 0x570   : > { %2201 = vpow2.f32 %v1391_v47  ;;  %v2957_v52 = vsub.f32 %v2896_v63, %v1346_v49  ;;  %v2960_v48 = vsub.f32 %v2899_v0, %v1360_v51 }
 0x571   : > { %2203 = vpow2.f32 %v1389_v50 }
 0x572   : > { %v2198_v53 = vpop.eup %2197  ;;  %v1407_v54 = vmul.f32 1.442695, %v2960_v48  ;;  %2205 = vpow2.f32 %v1405_v18  ;;  %v1393_v57 = vmul.f32 1.442695, %v2957_v52 }
 0x573   : > { %v1362_v55 = vpop.xlane.xlu1 %1361  ;;  %1419 = vadd.xlane.f32.xlu0 %v2198_v53  ;;  %v1348_v56 = vpop.xlane.xlu0 %1347 }
 0x574   : > { %v2965_v58 = vsub.f32 %v2904_v8, %v1362_v55  ;;  %v2967_v59 = vsub.f32 %v1293_v13, %v1348_v56  ;;  %2207 = vpow2.f32 %v1407_v54 }
 0x575   : > { %2209 = vpow2.f32 %v1393_v57 }
 0x576   : > { %v2200_v60 = vpop.eup %2199  ;;  %v1395_v61 = vmul.f32 1.442695, %v2967_v59  ;;  %v1409_v0 = vmul.f32 1.442695, %v2965_v58 }
 0x577   : > { %v1350_v62 = vpop.xlane.xlu1 %1349  ;;  %1435 = vadd.xlane.f32.xlu0 %v2200_v60  ;;  %v1364_v63 = vpop.xlane.xlu0 %1363 }
 0x578   : > { %v2972_v1 = vsub.f32 %v2909_v15, %v1350_v62  ;;  %v2975_v2 = vsub.f32 %v2912_v16, %v1364_v63  ;;  %2211 = vpow2.f32 %v1395_v61 }
 0x579   : > { %2213 = vpow2.f32 %v1409_v0 }
 0x57a   : > { %v2202_v3 = vpop.eup %2201  ;;  %v1411_v4 = vmul.f32 1.442695, %v2975_v2  ;;  %v1397_v8 = vmul.f32 1.442695, %v2972_v1 }
 0x57b   : > { %v2204_v5 = vpop.eup %2203  ;;  %v1366_v6 = vpop.xlane.xlu1 %1365  ;;  %1423 = vadd.xlane.f32.xlu0 %v2202_v3 }
 0x57c   : > { %v1352_v7 = vpop.xlane.xlu0 %1351  ;;  %v2980_v9 = vsub.f32 %v2917_v25, %v1366_v6  ;;  %1421 = vadd.xlane.f32.xlu1 %v2204_v5  ;;  %2215 = vpow2.f32 %v1411_v4  ;;  %v2206_v11 = vpop.eup %2205 }
 0x57d   : > { %v2983_v10 = vsub.f32 %v2920_v30, %v1352_v7  ;;  %2217 = vpow2.f32 %v1397_v8 }
 0x57e   : > { %v2208_v13 = vpop.eup %2207  ;;  %v1413_v16 = vmul.f32 1.442695, %v2980_v9 }
 0x57f   : > { %v1399_v12 = vmul.f32 1.442695, %v2983_v10  ;;  %v1354_v14 = vpop.xlane.xlu1 %1353  ;;  %1439 = vadd.xlane.f32.xlu0 %v2208_v13  ;;  %v2210_v20 = vpop.eup %2209 }
 0x580   : > { %v1368_v15 = vpop.xlane.xlu0 %1367  ;;  %1437 = vadd.xlane.f32.xlu1 %v2206_v11  ;;  %v2991_v19 = vsub.f32 %v2925_v32, %v1354_v14 }
 0x581   : > { %v2988_v17 = vsub.f32 %v2928_v33, %v1368_v15  ;;  %2219 = vpow2.f32 %v1399_v12 }
 0x582   : > { %v2212_v22 = vpop.eup %2211  ;;  %2221 = vpow2.f32 %v1413_v16  ;;  %v1401_v24 = vmul.f32 1.442695, %v2991_v19 }
 0x583   : > { %v1415_v21 = vmul.f32 1.442695, %v2988_v17  ;;  %v1370_v23 = vpop.xlane.xlu1 %1369  ;;  %1427 = vadd.xlane.f32.xlu0 %v2212_v22  ;;  %v2214_v26 = vpop.eup %2213 }
 0x584   : > { %1425 = vadd.xlane.f32.xlu1 %v2210_v20  ;;  %v2996_v25 = vsub.f32 %v2933_v34, %v1370_v23 }
 0x585   : > { %2223 = vpow2.f32 %v1415_v21 }
 0x586   : > { %v2216_v27 = vpop.eup %2215  ;;  %2225 = vpow2.f32 %v1401_v24  ;;  %v1417_v28 = vmul.f32 1.442695, %v2996_v25 }
 0x587   : > { %1443 = vadd.xlane.f32.xlu0 %v2216_v27  ;;  %v2218_v29 = vpop.eup %2217 }
 0x588   : > { %1441 = vadd.xlane.f32.xlu1 %v2214_v26  ;;  %2227 = vpow2.f32 %v1417_v28 }
 0x58b   : > { %v2220_v30 = vpop.eup %2219 }
 0x58c   : > { %1429 = vadd.xlane.f32.xlu1 %v2218_v29  ;;  %1431 = vadd.xlane.f32.xlu0 %v2220_v30  ;;  %v2222_v31 = vpop.eup %2221 }
 0x58f   : > { %v2224_v32 = vpop.eup %2223 }
 0x590   : > { %1445 = vadd.xlane.f32.xlu1 %v2222_v31  ;;  %1447 = vadd.xlane.f32.xlu0 %v2224_v32  ;;  %v2226_v33 = vpop.eup %2225 }
 0x592   : > { %v2228_v34 = vpop.eup %2227 }
 0x594   : > { %1433 = vadd.xlane.f32.xlu1 %v2226_v33 }
 0x598   : > { %1449 = vadd.xlane.f32.xlu1 %v2228_v34 }
 0x600   : > { %v1420_v35 = vpop.xlane.xlu0 %1419 }
 0x601   : > { %2229 = vlog2.f32 %v1420_v35 }
 0x604   : > { %v1436_v37 = vpop.xlane.xlu0 %1435 }
 0x605   : > { %2231 = vlog2.f32 %v1436_v37 }
 0x608   : > { %v1424_v39 = vpop.xlane.xlu0 %1423 }
 0x609   : > { %v1422_v40 = vpop.xlane.xlu1 %1421  ;;  %2233 = vlog2.f32 %v1424_v39 }
 0x60a   : > { %2235 = vlog2.f32 %v1422_v40 }
 0x60b   : > { %v2230_v42 = vpop.eup %2229 }
 0x60c   : > { %v1452_v43 = vmul.f32 0.6931472, %v2230_v42  ;;  %v1440_v47 = vpop.xlane.xlu0 %1439 }
 0x60d   : > { %v1438_v44 = vpop.xlane.xlu1 %1437 }
 0x60e   : > { %v1483_v50 = vsub.f32 %v2937_v36, %v1452_v43  ;;  %2237 = vlog2.f32 %v1438_v44 }
 0x60f   : > { %v2232_v49 = vpop.eup %2231  ;;  %2239 = vlog2.f32 %v1440_v47 }
 0x610   : > { %1499 = vst [vmem:[%s2761_s20] sm:$0xff] %v1483_v50  ;;  %v1468_v51 = vmul.f32 0.6931472, %v2232_v49  ;;  %v1428_v53 = vpop.xlane.xlu0 %1427 }
 0x611   : > { %v1426_v18 = vpop.xlane.xlu1 %1425 }
 0x612   : > { %v1491_v54 = vsub.f32 %v2941_v41, %v1468_v51  ;;  %2241 = vlog2.f32 %v1426_v18 }
 0x613   : > { %v2234_v55 = vpop.eup %2233  ;;  %2243 = vlog2.f32 %v1428_v53 }
 0x614   : > { %v2236_v56 = vpop.eup %2235  ;;  %1507 = vst [vmem:[%s2761_s20 + $0x40] sm:$0xff] %v1491_v54  ;;  %v1456_v57 = vmul.f32 0.6931472, %v2234_v55  ;;  %v1444_v36 = vpop.xlane.xlu0 %1443 }
 0x615   : > { %v1454_v60 = vmul.f32 0.6931472, %v2236_v56  ;;  %v1442_v61 = vpop.xlane.xlu1 %1441 }
 0x616   : > { %v1485_v62 = vsub.f32 %v2948_v45, %v1456_v57  ;;  %2245 = vlog2.f32 %v1442_v61 }
 0x617   : > { %v1484_v63 = vsub.f32 %v2951_v46, %v1454_v60  ;;  %2247 = vlog2.f32 %v1444_v36 }
 0x618   : > { %v2238_v0 = vpop.eup %2237  ;;  %1501 = vst [vmem:[%s2761_s20 + $0x10] sm:$0xff] %v1485_v62 }
 0x619   : > { %v2240_v41 = vpop.eup %2239  ;;  %1500 = vst [vmem:[%s2761_s20 + $0x8] sm:$0xff] %v1484_v63  ;;  %v1470_v3 = vmul.f32 0.6931472, %v2238_v0  ;;  %v1430_v4 = vpop.xlane.xlu1 %1429 }
 0x61a   : > { %v1432_v5 = vpop.xlane.xlu0 %1431  ;;  %v1472_v6 = vmul.f32 0.6931472, %v2240_v41  ;;  %2249 = vlog2.f32 %v1430_v4 }
 0x61b   : > { %v1492_v7 = vsub.f32 %v2945_v38, %v1470_v3  ;;  %2251 = vlog2.f32 %v1432_v5 }
 0x61c   : > { %v2242_v45 = vpop.eup %2241  ;;  %v1493_v8 = vsub.f32 %v2960_v48, %v1472_v6 }
 0x61d   : > { %v2244_v46 = vpop.eup %2243  ;;  %1508 = vst [vmem:[%s2761_s20 + $0x48] sm:$0xff] %v1492_v7  ;;  %v1458_v11 = vmul.f32 0.6931472, %v2242_v45  ;;  %v1446_v12 = vpop.xlane.xlu1 %1445 }
 0x61e   : > { %v1448_v13 = vpop.xlane.xlu0 %1447  ;;  %1509 = vst [vmem:[%s2761_s20 + $0x50] sm:$0xff] %v1493_v8  ;;  %v1460_v14 = vmul.f32 0.6931472, %v2244_v46  ;;  %2253 = vlog2.f32 %v1446_v12 }
 0x61f   : > { %v1486_v15 = vsub.f32 %v2957_v52, %v1458_v11  ;;  %2255 = vlog2.f32 %v1448_v13 }
 0x620   : > { %v2246_v16 = vpop.eup %2245  ;;  %v1487_v38 = vsub.f32 %v2967_v59, %v1460_v14 }
 0x621   : > { %v2248_v20 = vpop.eup %2247  ;;  %1502 = vst [vmem:[%s2761_s20 + $0x18] sm:$0xff] %v1486_v15  ;;  %v1474_v48 = vmul.f32 0.6931472, %v2246_v16  ;;  %v1434_v21 = vpop.xlane.xlu1 %1433 }
 0x622   : > { %1503 = vst [vmem:[%s2761_s20 + $0x20] sm:$0xff] %v1487_v38  ;;  %v1476_v22 = vmul.f32 0.6931472, %v2248_v20  ;;  %2257 = vlog2.f32 %v1434_v21 }
 0x623   : > { %v1494_v23 = vsub.f32 %v2965_v58, %v1474_v48 }
 0x624   : > { %v2250_v24 = vpop.eup %2249  ;;  %v1495_v26 = vsub.f32 %v2975_v2, %v1476_v22 }
 0x625   : > { %v2252_v52 = vpop.eup %2251  ;;  %1510 = vst [vmem:[%s2761_s20 + $0x58] sm:$0xff] %v1494_v23  ;;  %v1462_v27 = vmul.f32 0.6931472, %v2250_v24  ;;  %v1450_v28 = vpop.xlane.xlu1 %1449 }
 0x626   : > { %1511 = vst [vmem:[%s2761_s20 + $0x60] sm:$0xff] %v1495_v26  ;;  %v1464_v59 = vmul.f32 0.6931472, %v2252_v52  ;;  %2259 = vlog2.f32 %v1450_v28 }
 0x627   : > { %v1488_v29 = vsub.f32 %v2972_v1, %v1462_v27 }
 0x628   : > { %v2254_v30 = vpop.eup %2253  ;;  %v1489_v31 = vsub.f32 %v2983_v10, %v1464_v59 }
 0x629   : > { %v2256_v58 = vpop.eup %2255  ;;  %1504 = vst [vmem:[%s2761_s20 + $0x28] sm:$0xff] %v1488_v29  ;;  %v1478_v32 = vmul.f32 0.6931472, %v2254_v30 }
 0x62a   : > { %1505 = vst [vmem:[%s2761_s20 + $0x30] sm:$0xff] %v1489_v31  ;;  %v1480_v2 = vmul.f32 0.6931472, %v2256_v58 }
 0x62b   : > { %v1496_v33 = vsub.f32 %v2980_v9, %v1478_v32 }
 0x62c   : > { %v2258_v34 = vpop.eup %2257  ;;  %v1497_v35 = vsub.f32 %v2988_v17, %v1480_v2 }
 0x62d   : > { %1512 = vst [vmem:[%s2761_s20 + $0x68] sm:$0xff] %v1496_v33  ;;  %v1466_v37 = vmul.f32 0.6931472, %v2258_v34 }
 0x62e   : > { %1513 = vst [vmem:[%s2761_s20 + $0x70] sm:$0xff] %v1497_v35 }
 0x62f   : > { %v1490_v1 = vsub.f32 %v2991_v19, %v1466_v37 }
 0x630   : > { %v2260_v39 = vpop.eup %2259 }
 0x631   : > { %1506 = vst [vmem:[%s2761_s20 + $0x38] sm:$0xff] %v1490_v1  ;;  %v1482_v40 = vmul.f32 0.6931472, %v2260_v39 }
 0x633   : > { %v1498_v10 = vsub.f32 %v2996_v25, %v1482_v40 }
 0x635   : > { %1514 = vst [vmem:[%s2761_s20 + $0x78] sm:$0xff] %v1498_v10 }
 0x636 PF: > { %s23_s28 = sadd.s32 1, %s2455_s28   ;;  %s3090_s25 = sld [smem:[#allocation16_spill]] }
 0x637   : > { %p20_p9 = scmp.ge.s32.totalorder %s23_s28, 8   ;;  %s3091_s29 = sld [smem:[#allocation17_spill]] }
 0x638   : > { %s3092_s27 = sld [smem:[#allocation18_spill]]  ;;  %s3093_s21 = smov %s2431_s22 }
 0x639   : > { %s3094_s22 = smov %s2435_s23  ;;  %s3095_s23 = smov %s2655_s19 }
 0x63a   : > { %s3096_s24 = smov %s2447_s26  ;;  %22 = sbr.rel (!%p20_p9) target bundleno = 12 (0xc), region = 122 }
 0x63d   : > { %s3097_s26 = smov %s3091_s29 }
 0x641   :  { %1543 = vsyncpa [#allocation6], 1 }
 0x642   :  { %1545 = vsyncpa [#allocation6 + $0x1], 1 }
 0x643   :  { %1546 = vsyncpa [#allocation8], 1 }
 0x644   :  { %1548 = vsyncpa [#allocation8 + $0x1], 1 }
 0x645   :  { %1549 = vsyncpa [#allocation11], 1 }

</bundles_post_ra>
